<compile_context>
chip_gen: v5e
topology: v5e:2x2
jax: 0.10.0
libtpu: 0.0.40
codegen_flags: <defaults>
</compile_context>

<pallas_src>
import functools
import math

import numpy as np
import jax
import jax.numpy as jnp
from jax import lax
from jax.experimental import pallas as pl
from jax.experimental.pallas import tpu as pltpu

LANE = 128          # lane width: channel dims padded to a multiple of this
_STATS_ROWS = 8     # sublane-aligned rows for the per-tile stats output
_EPS = 1e-5         # BatchNorm2d default eps


def _round_up(x, m):
    return ((x + m - 1) // m) * m


# --------------------------------------------------------------------------------------
# Kernel 1: convolution (SAME, no bias) + per-channel partial BN statistics.
# One grid step handles one batch item; conv is K*K shifted matmuls, each with a
# 128-deep (padded-channel) contraction on the MXU, accumulated in f32.
# --------------------------------------------------------------------------------------
def _conv_stats_kernel(x_ref, w_ref, conv_ref, stats_ref, *, K, H, W):
    # x_ref    : (1, H+K-1, W+K-1, Cp)  spatially + channel padded NHWC input
    # w_ref    : (K*K, Cp, Coutp)       taps-flattened, zero-padded conv weights
    # conv_ref : (1, H*W, Coutp)        raw (pre-BN) conv output, lane-dense
    # stats_ref: (1, 8, Coutp)          row 0 = sum, row 1 = sum of squares (rest 0)
    Cp = x_ref.shape[-1]
    Coutp = w_ref.shape[-1]

    acc = jnp.zeros((H * W, Coutp), jnp.float32)
    for dy in range(K):                      # static K*K tap loop
        for dx in range(K):
            patch = x_ref[0, dy:dy + H, dx:dx + W, :].reshape(H * W, Cp)
            acc = acc + jnp.dot(patch, w_ref[dy * K + dx],
                                preferred_element_type=jnp.float32)

    conv_ref[...] = acc[None]                # single full-lane store

    s = jnp.sum(acc, axis=0, keepdims=True)           # (1, Coutp)
    ss = jnp.sum(acc * acc, axis=0, keepdims=True)     # (1, Coutp)
    stats_ref[...] = jnp.concatenate(
        [s, ss, jnp.zeros((_STATS_ROWS - 2, Coutp), jnp.float32)], axis=0)[None]


# --------------------------------------------------------------------------------------
# Kernel 2: normalize (precomputed per-channel scale/shift) + ReLU.  Memory-bound,
# lane-dense elementwise pass, tiled over batch.
# --------------------------------------------------------------------------------------
def _bn_relu_kernel(conv_ref, scale_ref, shift_ref, o_ref):
    scale = scale_ref[...][None]             # (1, 1, Coutp)
    shift = shift_ref[...][None]
    o_ref[...] = jnp.maximum(conv_ref[...] * scale + shift, 0.0)


# --------------------------------------------------------------------------------------
# One convolution_layer: conv(pad=k//2, no bias) + BatchNorm2d(train) + ReLU.
# x_p: (N, H, W, Cp) channel-padded NHWC.  Returns (N, H, W, Coutp) channel-padded NHWC.
# --------------------------------------------------------------------------------------
def conv_bn_relu_layer(x_p, w_oihw, gamma, beta, kernel_size):
    N, H, W, Cp = x_p.shape
    Cout, Cin, K, _ = w_oihw.shape
    assert K == kernel_size and Cin <= Cp
    Coutp = _round_up(Cout, LANE)
    p = K // 2
    Hp, Wp = H + 2 * p, W + 2 * p

    # Spatial halo padding (plain-JAX glue; padded channels of x_p are already zero).
    x_pad = jnp.pad(x_p, ((0, 0), (p, p), (p, p), (0, 0)))

    # Weights: OIHW -> (K*K, Cp, Coutp), zero-padded on both channel dims.
    w = jnp.transpose(w_oihw, (2, 3, 1, 0)).astype(jnp.float32)      # (K, K, Cin, Cout)
    w = jnp.pad(w, ((0, 0), (0, 0), (0, Cp - Cin), (0, Coutp - Cout)))
    w = w.reshape(K * K, Cp, Coutp)

    cparams = pltpu.CompilerParams(
        dimension_semantics=("parallel",),            # batch axis shards across TCs (v7x)
        vmem_limit_bytes=32 * 1024 * 1024,            # safe on v5e/v6e/v7x; tiles are small
    )

    conv_raw, stats = pl.pallas_call(
        functools.partial(_conv_stats_kernel, K=K, H=H, W=W),
        grid=(N,),
        in_specs=[
            pl.BlockSpec((1, Hp, Wp, Cp), lambda n: (n, 0, 0, 0)),
            pl.BlockSpec((K * K, Cp, Coutp), lambda n: (0, 0, 0)),   # weights stay resident
        ],
        out_specs=[
            pl.BlockSpec((1, H * W, Coutp), lambda n: (n, 0, 0)),
            pl.BlockSpec((1, _STATS_ROWS, Coutp), lambda n: (n, 0, 0)),
        ],
        out_shape=[
            jax.ShapeDtypeStruct((N, H * W, Coutp), jnp.float32),
            jax.ShapeDtypeStruct((N, _STATS_ROWS, Coutp), jnp.float32),
        ],
        compiler_params=cparams,
    )(x_pad, w)

    # Cross-tile BN reduction (tiny per-channel vectors -> plain-JAX glue), f32 math.
    cnt = float(N * H * W)
    ch_sum = stats[:, 0, :Cout].sum(axis=0)
    ch_ssq = stats[:, 1, :Cout].sum(axis=0)
    mean = ch_sum / cnt
    var = ch_ssq / cnt - mean * mean                  # biased (training-mode) variance
    inv_std = lax.rsqrt(var + _EPS)
    scale = gamma.astype(jnp.float32) * inv_std
    shift = beta.astype(jnp.float32) - mean * scale
    scale_p = jnp.pad(scale, (0, Coutp - Cout)).reshape(1, Coutp)    # padded chans -> 0
    shift_p = jnp.pad(shift, (0, Coutp - Cout)).reshape(1, Coutp)

    y = pl.pallas_call(
        _bn_relu_kernel,
        grid=(N,),
        in_specs=[
            pl.BlockSpec((1, H * W, Coutp), lambda n: (n, 0, 0)),
            pl.BlockSpec((1, Coutp), lambda n: (0, 0)),
            pl.BlockSpec((1, Coutp), lambda n: (0, 0)),
        ],
        out_specs=pl.BlockSpec((1, H * W, Coutp), lambda n: (n, 0, 0)),
        out_shape=jax.ShapeDtypeStruct((N, H * W, Coutp), jnp.float32),
        compiler_params=cparams,
    )(conv_raw, scale_p, shift_p)

    return y.reshape(N, H, W, Coutp)


def double_convolution_forward(x_nchw, params, kernel_size=3):
    """Full double_convolution forward. x_nchw: (N, Cin, H, W) -> (N, Cout, H, W)."""
    N, Cin, H, W = x_nchw.shape
    Cout = params["w2"].shape[0]
    Cp_in = _round_up(Cin, LANE)

    x = jnp.transpose(x_nchw, (0, 2, 3, 1)).astype(jnp.float32)      # NCHW -> NHWC
    x = jnp.pad(x, ((0, 0), (0, 0), (0, 0), (0, Cp_in - Cin)))        # lane-pad channels

    y = conv_bn_relu_layer(x, params["w1"], params["g1"], params["b1"], kernel_size)
    y = conv_bn_relu_layer(y, params["w2"], params["g2"], params["b2"], kernel_size)

    y = y[..., :Cout]                                                 # drop channel padding
    return jnp.transpose(y, (0, 3, 1, 2))                             # NHWC -> NCHW


def init_params(key, input_channels, mid_channels, output_channels, kernel_size):
    """Deterministic init mimicking PyTorch defaults (uniform ±1/sqrt(fan_in); BN gamma=1, beta=0)."""
    k1, k2 = jax.random.split(key)
    fan1 = input_channels * kernel_size * kernel_size
    fan2 = mid_channels * kernel_size * kernel_size
    w1 = jax.random.uniform(k1, (mid_channels, input_channels, kernel_size, kernel_size),
                            jnp.float32, -1.0 / math.sqrt(fan1), 1.0 / math.sqrt(fan1))
    w2 = jax.random.uniform(k2, (output_channels, mid_channels, kernel_size, kernel_size),
                            jnp.float32, -1.0 / math.sqrt(fan2), 1.0 / math.sqrt(fan2))
    return {
        "w1": w1, "g1": jnp.ones((mid_channels,), jnp.float32),
        "b1": jnp.zeros((mid_channels,), jnp.float32),
        "w2": w2, "g2": jnp.ones((output_channels,), jnp.float32),
        "b2": jnp.zeros((output_channels,), jnp.float32),
    }


# ------------------------------- pure-JAX reference ------------------------------------
def _ref_layer(x_nchw, w_oihw, gamma, beta):
    y = lax.conv_general_dilated(x_nchw, w_oihw, (1, 1), "SAME",
                                 dimension_numbers=("NCHW", "OIHW", "NCHW"))
    mean = y.mean(axis=(0, 2, 3), keepdims=True)
    var = ((y - mean) ** 2).mean(axis=(0, 2, 3), keepdims=True)
    y = (y - mean) / jnp.sqrt(var + _EPS)
    y = y * gamma.reshape(1, -1, 1, 1) + beta.reshape(1, -1, 1, 1)
    return jnp.maximum(y, 0.0)


def _ref_double(x_nchw, params):
    y = _ref_layer(x_nchw, params["w1"], params["g1"], params["b1"])
    return _ref_layer(y, params["w2"], params["g2"], params["b2"])


if __name__ == "__main__":
    key = jax.random.PRNGKey(0)
    kx, kp = jax.random.split(key)

    N, Cin, Cmid, Cout, H, W, K = 2, 4, 4, 4, 16, 16, 3
    x = jax.random.normal(kx, (N, Cin, H, W), jnp.float32)            # NCHW, as PyTorch
    params = init_params(kp, Cin, Cmid, Cout, K)

    fwd = jax.jit(functools.partial(double_convolution_forward, kernel_size=K))
    out = jax.block_until_ready(fwd(x, params))

    ref = jax.block_until_ready(_ref_double(x, params))
    assert out.shape == (N, Cout, H, W)
    np.testing.assert_allclose(np.asarray(out), np.asarray(ref), atol=1e-4, rtol=1e-4)

    print("KERNEL_OK")
</pallas_src>

<mosaic_0001>
module attributes {stable_mosaic.version = 11 : i64} {
  func.func @_conv_stats_kernel(%arg0: i32, %arg1: memref<1x18x18x128xf32, #tpu.memory_space<vmem>>, %arg2: memref<9x128x128xf32, #tpu.memory_space<vmem>>, %arg3: memref<1x256x128xf32, #tpu.memory_space<vmem>>, %arg4: memref<1x8x128xf32, #tpu.memory_space<vmem>>) attributes {dimension_semantics = [#tpu.dimension_semantics<parallel>], iteration_bounds = array<i64: 2>, scalar_prefetch = 0 : i64, scratch_operands = 0 : i64, tpu.core_type = #tpu.core_type<tc>, window_params = [{transform_indices = @transform_0, window_bounds = array<i64: 1, 18, 18, 128>}, {pipeline_mode = #tpu.pipeline_mode<synchronous>, transform_indices = @transform_1, window_bounds = array<i64: 9, 128, 128>}, {transform_indices = @transform_2, window_bounds = array<i64: 1, 256, 128>}, {transform_indices = @transform_3, window_bounds = array<i64: 1, 8, 128>}]} {
    %cst = arith.constant 0.000000e+00 : f32
    %0 = vector.broadcast %cst : f32 to vector<256x128xf32>
    %c0 = arith.constant 0 : index
    %c0_0 = arith.constant 0 : index
    %c0_1 = arith.constant 0 : index
    %c0_2 = arith.constant 0 : index
    %1 = vector.load %arg1[%c0, %c0_0, %c0_1, %c0_2] : memref<1x18x18x128xf32, #tpu.memory_space<vmem>>, vector<1x16x16x128xf32>
    %2 = vector.shape_cast %1 : vector<1x16x16x128xf32> to vector<16x16x128xf32>
    %3 = vector.shape_cast %2 : vector<16x16x128xf32> to vector<256x128xf32>
    %c0_3 = arith.constant 0 : index
    %c0_4 = arith.constant 0 : index
    %c0_5 = arith.constant 0 : index
    %4 = vector.load %arg2[%c0_3, %c0_4, %c0_5] : memref<9x128x128xf32, #tpu.memory_space<vmem>>, vector<1x128x128xf32>
    %5 = vector.shape_cast %4 : vector<1x128x128xf32> to vector<128x128xf32>
    %cst_6 = arith.constant dense<0.000000e+00> : vector<256x128xf32>
    %6 = tpu.matmul %3, %5, %cst_6 {dimension_numbers = #tpu.dot_dimension_numbers<[1], [0], [0], [1], [0, 0, 1, 1], [], []>} : vector<256x128xf32>, vector<128x128xf32>, vector<256x128xf32> -> vector<256x128xf32>
    %7 = arith.addf %0, %6 : vector<256x128xf32>
    %c0_7 = arith.constant 0 : index
    %c0_8 = arith.constant 0 : index
    %c1 = arith.constant 1 : index
    %c0_9 = arith.constant 0 : index
    %8 = vector.load %arg1[%c0_7, %c0_8, %c1, %c0_9] : memref<1x18x18x128xf32, #tpu.memory_space<vmem>>, vector<1x16x16x128xf32>
    %9 = vector.shape_cast %8 : vector<1x16x16x128xf32> to vector<16x16x128xf32>
    %10 = vector.shape_cast %9 : vector<16x16x128xf32> to vector<256x128xf32>
    %c1_10 = arith.constant 1 : index
    %c0_11 = arith.constant 0 : index
    %c0_12 = arith.constant 0 : index
    %11 = vector.load %arg2[%c1_10, %c0_11, %c0_12] : memref<9x128x128xf32, #tpu.memory_space<vmem>>, vector<1x128x128xf32>
    %12 = vector.shape_cast %11 : vector<1x128x128xf32> to vector<128x128xf32>
    %cst_13 = arith.constant dense<0.000000e+00> : vector<256x128xf32>
    %13 = tpu.matmul %10, %12, %cst_13 {dimension_numbers = #tpu.dot_dimension_numbers<[1], [0], [0], [1], [0, 0, 1, 1], [], []>} : vector<256x128xf32>, vector<128x128xf32>, vector<256x128xf32> -> vector<256x128xf32>
    %14 = arith.addf %7, %13 : vector<256x128xf32>
    %c0_14 = arith.constant 0 : index
    %c0_15 = arith.constant 0 : index
    %c2 = arith.constant 2 : index
    %c0_16 = arith.constant 0 : index
    %15 = vector.load %arg1[%c0_14, %c0_15, %c2, %c0_16] : memref<1x18x18x128xf32, #tpu.memory_space<vmem>>, vector<1x16x16x128xf32>
    %16 = vector.shape_cast %15 : vector<1x16x16x128xf32> to vector<16x16x128xf32>
    %17 = vector.shape_cast %16 : vector<16x16x128xf32> to vector<256x128xf32>
    %c2_17 = arith.constant 2 : index
    %c0_18 = arith.constant 0 : index
    %c0_19 = arith.constant 0 : index
    %18 = vector.load %arg2[%c2_17, %c0_18, %c0_19] : memref<9x128x128xf32, #tpu.memory_space<vmem>>, vector<1x128x128xf32>
    %19 = vector.shape_cast %18 : vector<1x128x128xf32> to vector<128x128xf32>
    %cst_20 = arith.constant dense<0.000000e+00> : vector<256x128xf32>
    %20 = tpu.matmul %17, %19, %cst_20 {dimension_numbers = #tpu.dot_dimension_numbers<[1], [0], [0], [1], [0, 0, 1, 1], [], []>} : vector<256x128xf32>, vector<128x128xf32>, vector<256x128xf32> -> vector<256x128xf32>
    %21 = arith.addf %14, %20 : vector<256x128xf32>
    %c0_21 = arith.constant 0 : index
    %c1_22 = arith.constant 1 : index
    %c0_23 = arith.constant 0 : index
    %c0_24 = arith.constant 0 : index
    %22 = vector.load %arg1[%c0_21, %c1_22, %c0_23, %c0_24] : memref<1x18x18x128xf32, #tpu.memory_space<vmem>>, vector<1x16x16x128xf32>
    %23 = vector.shape_cast %22 : vector<1x16x16x128xf32> to vector<16x16x128xf32>
    %24 = vector.shape_cast %23 : vector<16x16x128xf32> to vector<256x128xf32>
    %c3 = arith.constant 3 : index
    %c0_25 = arith.constant 0 : index
    %c0_26 = arith.constant 0 : index
    %25 = vector.load %arg2[%c3, %c0_25, %c0_26] : memref<9x128x128xf32, #tpu.memory_space<vmem>>, vector<1x128x128xf32>
    %26 = vector.shape_cast %25 : vector<1x128x128xf32> to vector<128x128xf32>
    %cst_27 = arith.constant dense<0.000000e+00> : vector<256x128xf32>
    %27 = tpu.matmul %24, %26, %cst_27 {dimension_numbers = #tpu.dot_dimension_numbers<[1], [0], [0], [1], [0, 0, 1, 1], [], []>} : vector<256x128xf32>, vector<128x128xf32>, vector<256x128xf32> -> vector<256x128xf32>
    %28 = arith.addf %21, %27 : vector<256x128xf32>
    %c0_28 = arith.constant 0 : index
    %c1_29 = arith.constant 1 : index
    %c1_30 = arith.constant 1 : index
    %c0_31 = arith.constant 0 : index
    %29 = vector.load %arg1[%c0_28, %c1_29, %c1_30, %c0_31] : memref<1x18x18x128xf32, #tpu.memory_space<vmem>>, vector<1x16x16x128xf32>
    %30 = vector.shape_cast %29 : vector<1x16x16x128xf32> to vector<16x16x128xf32>
    %31 = vector.shape_cast %30 : vector<16x16x128xf32> to vector<256x128xf32>
    %c4 = arith.constant 4 : index
    %c0_32 = arith.constant 0 : index
    %c0_33 = arith.constant 0 : index
    %32 = vector.load %arg2[%c4, %c0_32, %c0_33] : memref<9x128x128xf32, #tpu.memory_space<vmem>>, vector<1x128x128xf32>
    %33 = vector.shape_cast %32 : vector<1x128x128xf32> to vector<128x128xf32>
    %cst_34 = arith.constant dense<0.000000e+00> : vector<256x128xf32>
    %34 = tpu.matmul %31, %33, %cst_34 {dimension_numbers = #tpu.dot_dimension_numbers<[1], [0], [0], [1], [0, 0, 1, 1], [], []>} : vector<256x128xf32>, vector<128x128xf32>, vector<256x128xf32> -> vector<256x128xf32>
    %35 = arith.addf %28, %34 : vector<256x128xf32>
    %c0_35 = arith.constant 0 : index
    %c1_36 = arith.constant 1 : index
    %c2_37 = arith.constant 2 : index
    %c0_38 = arith.constant 0 : index
    %36 = vector.load %arg1[%c0_35, %c1_36, %c2_37, %c0_38] : memref<1x18x18x128xf32, #tpu.memory_space<vmem>>, vector<1x16x16x128xf32>
    %37 = vector.shape_cast %36 : vector<1x16x16x128xf32> to vector<16x16x128xf32>
    %38 = vector.shape_cast %37 : vector<16x16x128xf32> to vector<256x128xf32>
    %c5 = arith.constant 5 : index
    %c0_39 = arith.constant 0 : index
    %c0_40 = arith.constant 0 : index
    %39 = vector.load %arg2[%c5, %c0_39, %c0_40] : memref<9x128x128xf32, #tpu.memory_space<vmem>>, vector<1x128x128xf32>
    %40 = vector.shape_cast %39 : vector<1x128x128xf32> to vector<128x128xf32>
    %cst_41 = arith.constant dense<0.000000e+00> : vector<256x128xf32>
    %41 = tpu.matmul %38, %40, %cst_41 {dimension_numbers = #tpu.dot_dimension_numbers<[1], [0], [0], [1], [0, 0, 1, 1], [], []>} : vector<256x128xf32>, vector<128x128xf32>, vector<256x128xf32> -> vector<256x128xf32>
    %42 = arith.addf %35, %41 : vector<256x128xf32>
    %c0_42 = arith.constant 0 : index
    %c2_43 = arith.constant 2 : index
    %c0_44 = arith.constant 0 : index
    %c0_45 = arith.constant 0 : index
    %43 = vector.load %arg1[%c0_42, %c2_43, %c0_44, %c0_45] : memref<1x18x18x128xf32, #tpu.memory_space<vmem>>, vector<1x16x16x128xf32>
    %44 = vector.shape_cast %43 : vector<1x16x16x128xf32> to vector<16x16x128xf32>
    %45 = vector.shape_cast %44 : vector<16x16x128xf32> to vector<256x128xf32>
    %c6 = arith.constant 6 : index
    %c0_46 = arith.constant 0 : index
    %c0_47 = arith.constant 0 : index
    %46 = vector.load %arg2[%c6, %c0_46, %c0_47] : memref<9x128x128xf32, #tpu.memory_space<vmem>>, vector<1x128x128xf32>
    %47 = vector.shape_cast %46 : vector<1x128x128xf32> to vector<128x128xf32>
    %cst_48 = arith.constant dense<0.000000e+00> : vector<256x128xf32>
    %48 = tpu.matmul %45, %47, %cst_48 {dimension_numbers = #tpu.dot_dimension_numbers<[1], [0], [0], [1], [0, 0, 1, 1], [], []>} : vector<256x128xf32>, vector<128x128xf32>, vector<256x128xf32> -> vector<256x128xf32>
    %49 = arith.addf %42, %48 : vector<256x128xf32>
    %c0_49 = arith.constant 0 : index
    %c2_50 = arith.constant 2 : index
    %c1_51 = arith.constant 1 : index
    %c0_52 = arith.constant 0 : index
    %50 = vector.load %arg1[%c0_49, %c2_50, %c1_51, %c0_52] : memref<1x18x18x128xf32, #tpu.memory_space<vmem>>, vector<1x16x16x128xf32>
    %51 = vector.shape_cast %50 : vector<1x16x16x128xf32> to vector<16x16x128xf32>
    %52 = vector.shape_cast %51 : vector<16x16x128xf32> to vector<256x128xf32>
    %c7 = arith.constant 7 : index
    %c0_53 = arith.constant 0 : index
    %c0_54 = arith.constant 0 : index
    %53 = vector.load %arg2[%c7, %c0_53, %c0_54] : memref<9x128x128xf32, #tpu.memory_space<vmem>>, vector<1x128x128xf32>
    %54 = vector.shape_cast %53 : vector<1x128x128xf32> to vector<128x128xf32>
    %cst_55 = arith.constant dense<0.000000e+00> : vector<256x128xf32>
    %55 = tpu.matmul %52, %54, %cst_55 {dimension_numbers = #tpu.dot_dimension_numbers<[1], [0], [0], [1], [0, 0, 1, 1], [], []>} : vector<256x128xf32>, vector<128x128xf32>, vector<256x128xf32> -> vector<256x128xf32>
    %56 = arith.addf %49, %55 : vector<256x128xf32>
    %c0_56 = arith.constant 0 : index
    %c2_57 = arith.constant 2 : index
    %c2_58 = arith.constant 2 : index
    %c0_59 = arith.constant 0 : index
    %57 = vector.load %arg1[%c0_56, %c2_57, %c2_58, %c0_59] : memref<1x18x18x128xf32, #tpu.memory_space<vmem>>, vector<1x16x16x128xf32>
    %58 = vector.shape_cast %57 : vector<1x16x16x128xf32> to vector<16x16x128xf32>
    %59 = vector.shape_cast %58 : vector<16x16x128xf32> to vector<256x128xf32>
    %c8 = arith.constant 8 : index
    %c0_60 = arith.constant 0 : index
    %c0_61 = arith.constant 0 : index
    %60 = vector.load %arg2[%c8, %c0_60, %c0_61] : memref<9x128x128xf32, #tpu.memory_space<vmem>>, vector<1x128x128xf32>
    %61 = vector.shape_cast %60 : vector<1x128x128xf32> to vector<128x128xf32>
    %cst_62 = arith.constant dense<0.000000e+00> : vector<256x128xf32>
    %62 = tpu.matmul %59, %61, %cst_62 {dimension_numbers = #tpu.dot_dimension_numbers<[1], [0], [0], [1], [0, 0, 1, 1], [], []>} : vector<256x128xf32>, vector<128x128xf32>, vector<256x128xf32> -> vector<256x128xf32>
    %63 = arith.addf %56, %62 : vector<256x128xf32>
    %64 = vector.shape_cast %63 : vector<256x128xf32> to vector<1x256x128xf32>
    %c0_63 = arith.constant 0 : index
    %c0_64 = arith.constant 0 : index
    %c0_65 = arith.constant 0 : index
    %65 = vector.load %arg3[%c0_63, %c0_64, %c0_65] : memref<1x256x128xf32, #tpu.memory_space<vmem>>, vector<1x256x128xf32>
    tpu.vector_store %arg3[%c0_63, %c0_64, %c0_65], %64 {strides = array<i32>} : memref<1x256x128xf32, #tpu.memory_space<vmem>>, vector<1x256x128xf32>,
    %cst_66 = arith.constant dense<0.000000e+00> : vector<128xf32>
    %66 = vector.multi_reduction <add>, %63, %cst_66 [0] : vector<256x128xf32> to vector<128xf32>
    %67 = vector.shape_cast %66 : vector<128xf32> to vector<1x128xf32>
    %68 = arith.mulf %63, %63 : vector<256x128xf32>
    %cst_67 = arith.constant dense<0.000000e+00> : vector<128xf32>
    %69 = vector.multi_reduction <add>, %68, %cst_67 [0] : vector<256x128xf32> to vector<128xf32>
    %70 = vector.shape_cast %69 : vector<128xf32> to vector<1x128xf32>
    %cst_68 = arith.constant 0.000000e+00 : f32
    %71 = vector.broadcast %cst_68 : f32 to vector<6x128xf32>
    %72 = tpu.concatenate %67, %70, %71 in 0 : vector<1x128xf32>, vector<1x128xf32>, vector<6x128xf32> -> vector<8x128xf32>
    %73 = vector.shape_cast %72 : vector<8x128xf32> to vector<1x8x128xf32>
    %c0_69 = arith.constant 0 : index
    %c0_70 = arith.constant 0 : index
    %c0_71 = arith.constant 0 : index
    %74 = vector.load %arg4[%c0_69, %c0_70, %c0_71] : memref<1x8x128xf32, #tpu.memory_space<vmem>>, vector<1x8x128xf32>
    tpu.vector_store %arg4[%c0_69, %c0_70, %c0_71], %73 {strides = array<i32>} : memref<1x8x128xf32, #tpu.memory_space<vmem>>, vector<1x8x128xf32>,
    return
  }
  func.func @transform_0(%arg0: i32) -> (i32, i32, i32, i32) {
    %c0_i32 = arith.constant 0 : i32
    %c0_i32_0 = arith.constant 0 : i32
    %c0_i32_1 = arith.constant 0 : i32
    %c0_i32_2 = arith.constant 0 : i32
    return %arg0, %c0_i32, %c0_i32_0, %c0_i32_1 : i32, i32, i32, i32
  }
  func.func @transform_1(%arg0: i32) -> (i32, i32, i32) {
    %c0_i32 = arith.constant 0 : i32
    %c0_i32_0 = arith.constant 0 : i32
    %c0_i32_1 = arith.constant 0 : i32
    %c0_i32_2 = arith.constant 0 : i32
    return %c0_i32, %c0_i32_0, %c0_i32_1 : i32, i32, i32
  }
  func.func @transform_2(%arg0: i32) -> (i32, i32, i32) {
    %c0_i32 = arith.constant 0 : i32
    %c0_i32_0 = arith.constant 0 : i32
    %c0_i32_1 = arith.constant 0 : i32
    return %arg0, %c0_i32, %c0_i32_0 : i32, i32, i32
  }
  func.func @transform_3(%arg0: i32) -> (i32, i32, i32) {
    %c0_i32 = arith.constant 0 : i32
    %c0_i32_0 = arith.constant 0 : i32
    %c0_i32_1 = arith.constant 0 : i32
    return %arg0, %c0_i32, %c0_i32_0 : i32, i32, i32
  }
}

module attributes {stable_mosaic.version = 11 : i64} {
  func.func @_bn_relu_kernel(%arg0: i32, %arg1: memref<1x256x128xf32, #tpu.memory_space<vmem>>, %arg2: memref<1x128xf32, #tpu.memory_space<vmem>>, %arg3: memref<1x128xf32, #tpu.memory_space<vmem>>, %arg4: memref<1x256x128xf32, #tpu.memory_space<vmem>>) attributes {dimension_semantics = [#tpu.dimension_semantics<parallel>], iteration_bounds = array<i64: 2>, scalar_prefetch = 0 : i64, scratch_operands = 0 : i64, tpu.core_type = #tpu.core_type<tc>, window_params = [{transform_indices = @transform_0, window_bounds = array<i64: 1, 256, 128>}, {pipeline_mode = #tpu.pipeline_mode<synchronous>, transform_indices = @transform_1, window_bounds = array<i64: 1, 128>}, {pipeline_mode = #tpu.pipeline_mode<synchronous>, transform_indices = @transform_2, window_bounds = array<i64: 1, 128>}, {transform_indices = @transform_3, window_bounds = array<i64: 1, 256, 128>}]} {
    %c0 = arith.constant 0 : index
    %c0_0 = arith.constant 0 : index
    %0 = vector.load %arg2[%c0, %c0_0] : memref<1x128xf32, #tpu.memory_space<vmem>>, vector<1x128xf32>
    %1 = vector.shape_cast %0 : vector<1x128xf32> to vector<1x1x128xf32>
    %c0_1 = arith.constant 0 : index
    %c0_2 = arith.constant 0 : index
    %2 = vector.load %arg3[%c0_1, %c0_2] : memref<1x128xf32, #tpu.memory_space<vmem>>, vector<1x128xf32>
    %3 = vector.shape_cast %2 : vector<1x128xf32> to vector<1x1x128xf32>
    %c0_3 = arith.constant 0 : index
    %c0_4 = arith.constant 0 : index
    %c0_5 = arith.constant 0 : index
    %4 = vector.load %arg1[%c0_3, %c0_4, %c0_5] : memref<1x256x128xf32, #tpu.memory_space<vmem>>, vector<1x256x128xf32>
    %5 = vector.broadcast %1 : vector<1x1x128xf32> to vector<1x256x128xf32>
    %6 = arith.mulf %4, %5 : vector<1x256x128xf32>
    %7 = vector.broadcast %3 : vector<1x1x128xf32> to vector<1x256x128xf32>
    %8 = arith.addf %6, %7 : vector<1x256x128xf32>
    %cst = arith.constant 0.000000e+00 : f32
    %9 = vector.broadcast %cst : f32 to vector<1x256x128xf32>
    %10 = arith.maximumf %8, %9 : vector<1x256x128xf32>
    %c0_6 = arith.constant 0 : index
    %c0_7 = arith.constant 0 : index
    %c0_8 = arith.constant 0 : index
    %11 = vector.load %arg4[%c0_6, %c0_7, %c0_8] : memref<1x256x128xf32, #tpu.memory_space<vmem>>, vector<1x256x128xf32>
    tpu.vector_store %arg4[%c0_6, %c0_7, %c0_8], %10 {strides = array<i32>} : memref<1x256x128xf32, #tpu.memory_space<vmem>>, vector<1x256x128xf32>,
    return
  }
  func.func @transform_0(%arg0: i32) -> (i32, i32, i32) {
    %c0_i32 = arith.constant 0 : i32
    %c0_i32_0 = arith.constant 0 : i32
    %c0_i32_1 = arith.constant 0 : i32
    return %arg0, %c0_i32, %c0_i32_0 : i32, i32, i32
  }
  func.func @transform_1(%arg0: i32) -> (i32, i32) {
    %c0_i32 = arith.constant 0 : i32
    %c0_i32_0 = arith.constant 0 : i32
    %c0_i32_1 = arith.constant 0 : i32
    return %c0_i32, %c0_i32_0 : i32, i32
  }
  func.func @transform_2(%arg0: i32) -> (i32, i32) {
    %c0_i32 = arith.constant 0 : i32
    %c0_i32_0 = arith.constant 0 : i32
    %c0_i32_1 = arith.constant 0 : i32
    return %c0_i32, %c0_i32_0 : i32, i32
  }
  func.func @transform_3(%arg0: i32) -> (i32, i32, i32) {
    %c0_i32 = arith.constant 0 : i32
    %c0_i32_0 = arith.constant 0 : i32
    %c0_i32_1 = arith.constant 0 : i32
    return %arg0, %c0_i32, %c0_i32_0 : i32, i32, i32
  }
}

</mosaic_0001>

<bundles_post_ra>
// kernel: double_convolution_forward.5
= control target key start
LH: loop header
LB: loop body
LE: loop exit
PB: predicated region body
PF: predicated region fallthrough
CT: control target
= control target key end

     0   :  { %s445_s12 = smov 0   ;;  %s604_s0 = inlined_call_operand.vmem [shape: f32[2,256,128], index: 0, kind: input, shape index: {}]   ;;  %s605_s1 = inlined_call_operand.vmem [shape: f32[1,128], index: 1, kind: input, shape index: {}]   ;;  %s606_s2 = inlined_call_operand.vmem [shape: f32[1,128], index: 2, kind: input, shape index: {}]   ;;  %s607_s3 = inlined_call_operand.vmem [shape: f32[2,256,128], index: 3, kind: output, shape index: {}]  }
   0x1 LB: > { %s394_s13 = sadd.s32 4294967295, %s423_s12   ;;  %p398_p0 = scmp.ge.s32.totalorder %s423_s12, 1  ;;  %s423_s12 = sphi %s445_s12, %s13_s12  }
   0x2   : > { %p137_p1 = scmp.lt.s32.totalorder %s423_s12, 3 }
   0x4   : > { %p138_p2 = pnand %p398_p0, %p137_p1 }
   0x5   : > { %p161_p3 = scmp.lt.s32.totalorder (!%p138_p2), %s394_s13, 1 }
   0x6   : > { %141 = sbr.rel (%p138_p2) target bundleno = 53 (0x35), region = 32 }
   0xb   : > { %s609_s13 = smov (!%p161_p3, %s394_s13), 1  ;;  %v456_v0 = vld [vmem:[%s605_s1] ss:$0 sm:$0xff] }
   0xc   : > { %s405_s16 = sshll.u32 %s609_s13, 8  ;;  %v466_v1 = vld [vmem:[%s606_s2] ss:$0 sm:$0xff] }
   0xd   : > { %s461_s19 = scalar_lea.vmem %s604_s0, %s405_s16  ;;  %s489_s24 = scalar_lea.vmem %s607_s3, %s405_s16 }
   0xe   : > { %v173_v2 = vld [vmem:[%s461_s19] sm:$0xff]  ;;  %v174_v3 = vld [vmem:[%s461_s19 + $0x8] sm:$0xff]  ;;  %v175_v4 = vld [vmem:[%s461_s19 + $0x10] sm:$0xff] }
   0xf   : > { %v208_v5 = vmul.f32 %v456_v0, %v173_v2  ;;  %v209_v6 = vmul.f32 %v456_v0, %v174_v3  ;;  %v210_v7 = vmul.f32 %v456_v0, %v175_v4  ;;  %v176_v8 = vld [vmem:[%s461_s19 + $0x18] sm:$0xff]  ;;  %v177_v9 = vld [vmem:[%s461_s19 + $0x20] sm:$0xff]  ;;  %v178_v10 = vld [vmem:[%s461_s19 + $0x28] sm:$0xff] }
  0x10   : > { %v211_v11 = vmul.f32 %v456_v0, %v176_v8  ;;  %v212_v12 = vmul.f32 %v456_v0, %v177_v9  ;;  %v213_v13 = vmul.f32 %v456_v0, %v178_v10  ;;  %v179_v14 = vld [vmem:[%s461_s19 + $0x30] sm:$0xff]  ;;  %v180_v15 = vld [vmem:[%s461_s19 + $0x38] sm:$0xff]  ;;  %v181_v24 = vld [vmem:[%s461_s19 + $0x40] sm:$0xff] }
  0x11   : > { %v243_v16 = vadd.f32 %v466_v1, %v208_v5  ;;  %v244_v17 = vadd.f32 %v466_v1, %v209_v6  ;;  %v245_v18 = vadd.f32 %v466_v1, %v210_v7  ;;  %v214_v19 = vmul.f32 %v456_v0, %v179_v14  ;;  %v182_v25 = vld [vmem:[%s461_s19 + $0x48] sm:$0xff]  ;;  %v183_v26 = vld [vmem:[%s461_s19 + $0x50] sm:$0xff]  ;;  %v184_v31 = vld [vmem:[%s461_s19 + $0x58] sm:$0xff] }
  0x12   : > { %v246_v20 = vadd.f32 %v466_v1, %v211_v11  ;;  %v247_v21 = vadd.f32 %v466_v1, %v212_v12  ;;  %v248_v22 = vadd.f32 %v466_v1, %v213_v13  ;;  %v215_v23 = vmul.f32 %v456_v0, %v180_v15  ;;  %v185_v32 = vld [vmem:[%s461_s19 + $0x60] sm:$0xff]  ;;  %v186_v33 = vld [vmem:[%s461_s19 + $0x68] sm:$0xff]  ;;  %v187_v37 = vld [vmem:[%s461_s19 + $0x70] sm:$0xff] }
  0x13   : > { %v275_v27 = vmax.f32 %v243_v16, 0.0  ;;  %v276_v28 = vmax.f32 %v244_v17, 0.0  ;;  %v277_v29 = vmax.f32 %v245_v18, 0.0  ;;  %v249_v30 = vadd.f32 %v466_v1, %v214_v19  ;;  %v188_v42 = vld [vmem:[%s461_s19 + $0x78] sm:$0xff]  ;;  %v189_v54 = vld [vmem:[%s461_s19 + $0x80] sm:$0xff]  ;;  %v190_v55 = vld [vmem:[%s461_s19 + $0x88] sm:$0xff] }
  0x14   : > { %v278_v34 = vmax.f32 %v246_v20, 0.0  ;;  %v279_v35 = vmax.f32 %v247_v21, 0.0  ;;  %v250_v36 = vadd.f32 %v466_v1, %v215_v23  ;;  %v280_v38 = vmax.f32 %v248_v22, 0.0  ;;  %v191_v56 = vld [vmem:[%s461_s19 + $0x90] sm:$0xff]  ;;  %v192_v59 = vld [vmem:[%s461_s19 + $0x98] sm:$0xff]  ;;  %v193_v63 = vld [vmem:[%s461_s19 + $0xa0] sm:$0xff] }
  0x15   : > { %307 = vst [vmem:[%s489_s24] sm:$0xff] %v275_v27  ;;  %v216_v39 = vmul.f32 %v456_v0, %v181_v24  ;;  %v217_v40 = vmul.f32 %v456_v0, %v182_v25  ;;  %v218_v41 = vmul.f32 %v456_v0, %v183_v26  ;;  %v281_v43 = vmax.f32 %v249_v30, 0.0  ;;  %v194_v6 = vld [vmem:[%s461_s19 + $0xa8] sm:$0xff]  ;;  %v195_v10 = vld [vmem:[%s461_s19 + $0xb0] sm:$0xff]  ;;  %v196_v14 = vld [vmem:[%s461_s19 + $0xb8] sm:$0xff] }
  0x16   : > { %308 = vst [vmem:[%s489_s24 + $0x8] sm:$0xff] %v276_v28  ;;  %v219_v44 = vmul.f32 %v456_v0, %v184_v31  ;;  %v220_v45 = vmul.f32 %v456_v0, %v185_v32  ;;  %v221_v46 = vmul.f32 %v456_v0, %v186_v33  ;;  %v222_v50 = vmul.f32 %v456_v0, %v187_v37  ;;  %v197_v18 = vld [vmem:[%s461_s19 + $0xc0] sm:$0xff]  ;;  %v198_v22 = vld [vmem:[%s461_s19 + $0xc8] sm:$0xff]  ;;  %v199_v26 = vld [vmem:[%s461_s19 + $0xd0] sm:$0xff] }
  0x17   : > { %309 = vst [vmem:[%s489_s24 + $0x10] sm:$0xff] %v277_v29  ;;  %v251_v47 = vadd.f32 %v466_v1, %v216_v39  ;;  %v252_v48 = vadd.f32 %v466_v1, %v217_v40  ;;  %v253_v49 = vadd.f32 %v466_v1, %v218_v41  ;;  %v282_v51 = vmax.f32 %v250_v36, 0.0  ;;  %v200_v30 = vld [vmem:[%s461_s19 + $0xd8] sm:$0xff] }
  0x18   : > { %310 = vst [vmem:[%s489_s24 + $0x18] sm:$0xff] %v278_v34  ;;  %v254_v52 = vadd.f32 %v466_v1, %v219_v44  ;;  %v223_v53 = vmul.f32 %v456_v0, %v188_v42  ;;  %v255_v58 = vadd.f32 %v466_v1, %v220_v45  ;;  %v256_v62 = vadd.f32 %v466_v1, %v221_v46  ;;  %v201_v34 = vld [vmem:[%s461_s19 + $0xe0] sm:$0xff]  ;;  %v203_v42 = vld [vmem:[%s461_s19 + $0xf0] sm:$0xff]  ;;  %v204_v46 = vld [vmem:[%s461_s19 + $0xf8] sm:$0xff] }
  0x19   : > { %311 = vst [vmem:[%s489_s24 + $0x20] sm:$0xff] %v279_v35  ;;  %v283_v57 = vmax.f32 %v251_v47, 0.0  ;;  %v284_v60 = vmax.f32 %v252_v48, 0.0  ;;  %v285_v61 = vmax.f32 %v253_v49, 0.0  ;;  %v257_v2 = vadd.f32 %v466_v1, %v222_v50 }
  0x1a   : > { %312 = vst [vmem:[%s489_s24 + $0x28] sm:$0xff] %v280_v38  ;;  %v224_v3 = vmul.f32 %v456_v0, %v189_v54  ;;  %v225_v4 = vmul.f32 %v456_v0, %v190_v55  ;;  %v226_v5 = vmul.f32 %v456_v0, %v191_v56  ;;  %v286_v7 = vmax.f32 %v254_v52, 0.0  ;;  %v202_v38 = vld [vmem:[%s461_s19 + $0xe8] sm:$0xff] }
  0x1b   : > { %313 = vst [vmem:[%s489_s24 + $0x30] sm:$0xff] %v281_v43  ;;  %v258_v8 = vadd.f32 %v466_v1, %v223_v53  ;;  %v227_v9 = vmul.f32 %v456_v0, %v192_v59  ;;  %v287_v11 = vmax.f32 %v255_v58, 0.0  ;;  %v228_v13 = vmul.f32 %v456_v0, %v193_v63 }
  0x1c   : > { %314 = vst [vmem:[%s489_s24 + $0x38] sm:$0xff] %v282_v51  ;;  %v259_v12 = vadd.f32 %v466_v1, %v224_v3  ;;  %v288_v15 = vmax.f32 %v256_v62, 0.0  ;;  %v260_v16 = vadd.f32 %v466_v1, %v225_v4  ;;  %v229_v17 = vmul.f32 %v456_v0, %v194_v6 }
  0x1d   : > { %315 = vst [vmem:[%s489_s24 + $0x40] sm:$0xff] %v283_v57  ;;  %v289_v19 = vmax.f32 %v257_v2, 0.0  ;;  %v261_v20 = vadd.f32 %v466_v1, %v226_v5  ;;  %v230_v21 = vmul.f32 %v456_v0, %v195_v10  ;;  %v290_v23 = vmax.f32 %v258_v8, 0.0 }
  0x1e   : > { %316 = vst [vmem:[%s489_s24 + $0x48] sm:$0xff] %v284_v60  ;;  %v262_v24 = vadd.f32 %v466_v1, %v227_v9  ;;  %v231_v25 = vmul.f32 %v456_v0, %v196_v14  ;;  %v291_v27 = vmax.f32 %v259_v12, 0.0  ;;  %v263_v28 = vadd.f32 %v466_v1, %v228_v13 }
  0x1f   : > { %317 = vst [vmem:[%s489_s24 + $0x50] sm:$0xff] %v285_v61  ;;  %v232_v29 = vmul.f32 %v456_v0, %v197_v18  ;;  %v292_v31 = vmax.f32 %v260_v16, 0.0  ;;  %v264_v32 = vadd.f32 %v466_v1, %v229_v17  ;;  %v233_v33 = vmul.f32 %v456_v0, %v198_v22 }
  0x20   : > { %318 = vst [vmem:[%s489_s24 + $0x58] sm:$0xff] %v286_v7  ;;  %v293_v35 = vmax.f32 %v261_v20, 0.0  ;;  %v265_v36 = vadd.f32 %v466_v1, %v230_v21  ;;  %v234_v37 = vmul.f32 %v456_v0, %v199_v26  ;;  %v294_v39 = vmax.f32 %v262_v24, 0.0 }
  0x21   : > { %319 = vst [vmem:[%s489_s24 + $0x60] sm:$0xff] %v287_v11  ;;  %v266_v40 = vadd.f32 %v466_v1, %v231_v25  ;;  %v235_v41 = vmul.f32 %v456_v0, %v200_v30  ;;  %v295_v43 = vmax.f32 %v263_v28, 0.0  ;;  %v267_v44 = vadd.f32 %v466_v1, %v232_v29 }
  0x22   : > { %320 = vst [vmem:[%s489_s24 + $0x68] sm:$0xff] %v288_v15  ;;  %v236_v45 = vmul.f32 %v456_v0, %v201_v34  ;;  %v296_v47 = vmax.f32 %v264_v32, 0.0  ;;  %v268_v48 = vadd.f32 %v466_v1, %v233_v33  ;;  %v237_v49 = vmul.f32 %v456_v0, %v202_v38 }
  0x23   : > { %321 = vst [vmem:[%s489_s24 + $0x70] sm:$0xff] %v289_v19  ;;  %v297_v50 = vmax.f32 %v265_v36, 0.0  ;;  %v269_v51 = vadd.f32 %v466_v1, %v234_v37  ;;  %v238_v52 = vmul.f32 %v456_v0, %v203_v42  ;;  %v298_v53 = vmax.f32 %v266_v40, 0.0 }
  0x24   : > { %322 = vst [vmem:[%s489_s24 + $0x78] sm:$0xff] %v290_v23  ;;  %v270_v54 = vadd.f32 %v466_v1, %v235_v41  ;;  %v239_v55 = vmul.f32 %v456_v0, %v204_v46  ;;  %v299_v56 = vmax.f32 %v267_v44, 0.0  ;;  %v271_v57 = vadd.f32 %v466_v1, %v236_v45 }
  0x25   : > { %323 = vst [vmem:[%s489_s24 + $0x80] sm:$0xff] %v291_v27  ;;  %v300_v58 = vmax.f32 %v268_v48, 0.0  ;;  %v272_v59 = vadd.f32 %v466_v1, %v237_v49  ;;  %v301_v60 = vmax.f32 %v269_v51, 0.0  ;;  %v273_v61 = vadd.f32 %v466_v1, %v238_v52 }
  0x26   : > { %324 = vst [vmem:[%s489_s24 + $0x88] sm:$0xff] %v292_v31  ;;  %v302_v0 = vmax.f32 %v270_v54, 0.0  ;;  %v274_v62 = vadd.f32 %v466_v1, %v239_v55  ;;  %v303_v63 = vmax.f32 %v271_v57, 0.0 }
  0x27   : > { %325 = vst [vmem:[%s489_s24 + $0x90] sm:$0xff] %v293_v35  ;;  %v304_v2 = vmax.f32 %v272_v59, 0.0  ;;  %v305_v3 = vmax.f32 %v273_v61, 0.0 }
  0x28   : > { %326 = vst [vmem:[%s489_s24 + $0x98] sm:$0xff] %v294_v39  ;;  %v306_v4 = vmax.f32 %v274_v62, 0.0 }
  0x29   : > { %327 = vst [vmem:[%s489_s24 + $0xa0] sm:$0xff] %v295_v43 }
  0x2a   : > { %328 = vst [vmem:[%s489_s24 + $0xa8] sm:$0xff] %v296_v47 }
  0x2b   : > { %329 = vst [vmem:[%s489_s24 + $0xb0] sm:$0xff] %v297_v50 }
  0x2c   : > { %330 = vst [vmem:[%s489_s24 + $0xb8] sm:$0xff] %v298_v53 }
  0x2d   : > { %331 = vst [vmem:[%s489_s24 + $0xc0] sm:$0xff] %v299_v56 }
  0x2e   : > { %332 = vst [vmem:[%s489_s24 + $0xc8] sm:$0xff] %v300_v58 }
  0x2f   : > { %333 = vst [vmem:[%s489_s24 + $0xd0] sm:$0xff] %v301_v60 }
  0x30   : > { %334 = vst [vmem:[%s489_s24 + $0xd8] sm:$0xff] %v302_v0 }
  0x31   : > { %335 = vst [vmem:[%s489_s24 + $0xe0] sm:$0xff] %v303_v63 }
  0x32   : > { %336 = vst [vmem:[%s489_s24 + $0xe8] sm:$0xff] %v304_v2 }
  0x33   : > { %337 = vst [vmem:[%s489_s24 + $0xf0] sm:$0xff] %v305_v3 }
  0x34   : > { %338 = vst [vmem:[%s489_s24 + $0xf8] sm:$0xff] %v306_v4 }
  0x35 PF: > { %s13_s12 = sadd.s32 1, %s423_s12  }
  0x36   : > { %p10_p4 = scmp.ge.s32.totalorder %s13_s12, 4  }
  0x38   :  { %12 = sbr.rel (!%p10_p4) target bundleno = 1 (0x1), region = 62 }

// kernel: double_convolution_forward.4
= control target key start
LH: loop header
LB: loop body
LE: loop exit
PB: predicated region body
PF: predicated region fallthrough
CT: control target
= control target key end

     0   :  { %s2511_s12 = smov 0   ;;  %s3521_s0 = inlined_call_operand.vmem [shape: f32[2,18,18,128], index: 0, kind: input, shape index: {}]   ;;  %s3522_s1 = inlined_call_operand.vmem [shape: f32[9,128,128], index: 1, kind: input, shape index: {}]   ;;  %s3523_s2 = inlined_call_operand.vmem [shape: f32[2,256,128], index: 2, kind: output, shape index: {0}]   ;;  %s3524_s3 = inlined_call_operand.vmem [shape: f32[2,8,128], index: 3, kind: output, shape index: {1}]  }
   0x1 LB: > { %s2094_s13 = sadd.s32 4294967295, %s2489_s12   ;;  %p2098_p0 = scmp.ge.s32.totalorder %s2489_s12, 1  ;;  %s2489_s12 = sphi %s2511_s12, %s14_s12  }
   0x2   : > { %p140_p1 = scmp.lt.s32.totalorder %s2489_s12, 3 }
   0x4   : > { %p141_p2 = pnand %p2098_p0, %p140_p1 }
   0x5   : > { %p168_p3 = scmp.lt.s32.totalorder (!%p141_p2), %s2094_s13, 1 }
   0x6   : > { %144 = sbr.rel (%p141_p2) target bundleno = 768 (0x300), region = 28 }
   0xb   : > { %v2118_v0 = vld [vmem:[%s3522_s1 + $0xf8] sm:$0xff]  ;;  %v2117_v1 = vld [vmem:[%s3522_s1 + $0xf0] sm:$0xff]  ;;  %v2116_v2 = vld [vmem:[%s3522_s1 + $0xe8] sm:$0xff]  ;;  %s3526_s13 = smov (!%p168_p3, %s2094_s13), 1  ;;  %vm2003_vm0 = vcmask 1040384   ;;  %vm2005_vm1 = vcmask 1041408  }
   0xc   : > { %2426 = vmatpush.msra.mxu1 %v2118_v0  ;;  %2427 = vmatpush.msra.mxu2 %v2118_v0  ;;  %v2115_v3 = vld [vmem:[%s3522_s1 + $0xe0] sm:$0xff]  ;;  %v2114_v4 = vld [vmem:[%s3522_s1 + $0xd8] sm:$0xff]  ;;  %v2113_v5 = vld [vmem:[%s3522_s1 + $0xd0] sm:$0xff]  ;;  %s2474_s15 = smul.u32 432, %s3526_s13  ;;  %s2425_s16 = sshll.u32 %s3526_s13, 8 }
   0xd   : > { %2428 = vmatpush.msra.mxu3 %v2118_v0  ;;  %279 = vmatpush.msra.mxu0 %v2118_v0  ;;  %v2112_v6 = vld [vmem:[%s3522_s1 + $0xc8] sm:$0xff]  ;;  %v2111_v7 = vld [vmem:[%s3522_s1 + $0xc0] sm:$0xff]  ;;  %v2110_v8 = vld [vmem:[%s3522_s1 + $0xb8] sm:$0xff]  ;;  %s3405_s19 = scalar_lea.vmem %s3523_s2, %s2425_s16 }
   0xe   : > { %2429 = vmatpush.msra.mxu1 %v2117_v1  ;;  %2430 = vmatpush.msra.mxu2 %v2117_v1  ;;  %v2109_v9 = vld [vmem:[%s3522_s1 + $0xb0] sm:$0xff]  ;;  %v2108_v10 = vld [vmem:[%s3522_s1 + $0xa8] sm:$0xff]  ;;  %v2107_v11 = vld [vmem:[%s3522_s1 + $0xa0] sm:$0xff]  ;;  %s2574_s22 = scalar_lea.vmem %s3521_s0, %s2474_s15 }
   0xf   : > { %2431 = vmatpush.msra.mxu3 %v2117_v1  ;;  %280 = vmatpush.msra.mxu0 %v2117_v1  ;;  %v2106_v12 = vld [vmem:[%s3522_s1 + $0x98] sm:$0xff]  ;;  %v2105_v13 = vld [vmem:[%s3522_s1 + $0x90] sm:$0xff]  ;;  %v2104_v14 = vld [vmem:[%s3522_s1 + $0x88] sm:$0xff] }
  0x10   : > { %2432 = vmatpush.msra.mxu1 %v2116_v2  ;;  %2433 = vmatpush.msra.mxu2 %v2116_v2  ;;  %v2103_v15 = vld [vmem:[%s3522_s1 + $0x80] sm:$0xff]  ;;  %v2134_v18 = vld [vmem:[%s3522_s1 + $0x178] sm:$0xff]  ;;  %v2133_v22 = vld [vmem:[%s3522_s1 + $0x170] sm:$0xff] }
  0x11   : > { %2434 = vmatpush.msra.mxu3 %v2116_v2  ;;  %281 = vmatpush.msra.mxu0 %v2116_v2  ;;  %v2580_v16 = vld [vmem:[%s2574_s22 + $0x61] sm:$0xff]  ;;  %v229_v20 = vld [vmem:[%s3522_s1 + $0x78] sm:$0xff]  ;;  %v228_v23 = vld [vmem:[%s3522_s1 + $0x70] sm:$0xff] }
  0x12   : > { %2435 = vmatpush.msra.mxu1 %v2115_v3  ;;  %2436 = vmatpush.msra.mxu2 %v2115_v3  ;;  %v2583_v17 = vld [vmem:[%s2574_s22 + $0xc1] sm:$0xff]  ;;  %v2182_v21 = vld [vmem:[%s3522_s1 + $0x1f8] sm:$0xff]  ;;  %v2181_v24 = vld [vmem:[%s3522_s1 + $0x1f0] sm:$0xff] }
  0x13   : > { %2437 = vmatpush.msra.mxu3 %v2115_v3  ;;  %282 = vmatpush.msra.mxu0 %v2115_v3  ;;  %v254_v19 = vld [vmem:[%s2574_s22 + $0x121] sm:$0xff]  ;;  %v2230_v29 = vld [vmem:[%s3522_s1 + $0x278] sm:$0xff]  ;;  %v2620_v30 = vld [vmem:[%s2574_s22 + $0x69] sm:$0xff] }
  0x14   : > { %2438 = vmatpush.msra.mxu1 %v2114_v4  ;;  %2439 = vmatpush.msra.mxu2 %v2114_v4  ;;  %v2132_v25 = vld [vmem:[%s3522_s1 + $0x168] sm:$0xff]  ;;  %v2131_v32 = vld [vmem:[%s3522_s1 + $0x160] sm:$0xff]  ;;  %v2229_v35 = vld [vmem:[%s3522_s1 + $0x270] sm:$0xff] }
  0x15   : > { %2440 = vmatpush.msra.mxu3 %v2114_v4  ;;  %283 = vmatpush.msra.mxu0 %v2114_v4  ;;  %v230_v26 = vld [vmem:[%s2574_s22 + $0x1] sm:$0xff]  ;;  %v2623_v31 = vld [vmem:[%s2574_s22 + $0xc9] sm:$0xff]  ;;  %v2130_v37 = vld [vmem:[%s3522_s1 + $0x158] sm:$0xff] }
  0x16   : > { %2441 = vmatpush.msra.mxu1 %v2113_v5  ;;  %2442 = vmatpush.msra.mxu2 %v2113_v5  ;;  %v227_v27 = vld [vmem:[%s3522_s1 + $0x68] sm:$0xff]  ;;  %v2179_v33 = vld [vmem:[%s3522_s1 + $0x1e0] sm:$0xff]  ;;  %v2178_v38 = vld [vmem:[%s3522_s1 + $0x1d8] sm:$0xff] }
  0x17   : > { %2443 = vmatpush.msra.mxu3 %v2113_v5  ;;  %284 = vmatpush.msra.mxu0 %v2113_v5  ;;  %v2180_v28 = vld [vmem:[%s3522_s1 + $0x1e8] sm:$0xff]  ;;  %v226_v36 = vld [vmem:[%s3522_s1 + $0x60] sm:$0xff]  ;;  %v225_v40 = vld [vmem:[%s3522_s1 + $0x58] sm:$0xff] }
  0x18   : > { %2444 = vmatpush.msra.mxu1 %v2112_v6  ;;  %2445 = vmatpush.msra.mxu2 %v2112_v6  ;;  %v255_v34 = vld [vmem:[%s2574_s22 + $0x129] sm:$0xff]  ;;  %v2227_v44 = vld [vmem:[%s3522_s1 + $0x260] sm:$0xff]  ;;  %v2226_v51 = vld [vmem:[%s3522_s1 + $0x258] sm:$0xff] }
  0x19   : > { %2446 = vmatpush.msra.mxu3 %v2112_v6  ;;  %285 = vmatpush.msra.mxu0 %v2112_v6  ;;  %v2228_v39 = vld [vmem:[%s3522_s1 + $0x268] sm:$0xff]  ;;  %v2129_v41 = vld [vmem:[%s3522_s1 + $0x150] sm:$0xff]  ;;  %v2666_v46 = vld [vmem:[%s2574_s22 + $0x79] sm:$0xff] }
  0x1a   : > { %2447 = vmatpush.msra.mxu1 %v2111_v7  ;;  %2448 = vmatpush.msra.mxu2 %v2111_v7  ;;  %v231_v42 = vld [vmem:[%s2574_s22 + $0x9] sm:$0xff]  ;;  %v2669_v47 = vld [vmem:[%s2574_s22 + $0xd9] sm:$0xff]  ;;  %v2714_v62 = vld [vmem:[%s2574_s22 + $0x81] sm:$0xff] }
  0x1b   : > { %2449 = vmatpush.msra.mxu3 %v2111_v7  ;;  %286 = vmatpush.msra.mxu0 %v2111_v7  ;;  %v2177_v43 = vld [vmem:[%s3522_s1 + $0x1d0] sm:$0xff]  ;;  %v2128_v48 = vld [vmem:[%s3522_s1 + $0x148] sm:$0xff]  ;;  %v256_v50 = vld [vmem:[%s2574_s22 + $0x139] sm:$0xff] }
  0x1c   : > { %2450 = vmatpush.msra.mxu1 %v2110_v8  ;;  %2451 = vmatpush.msra.mxu2 %v2110_v8  ;;  %v224_v45 = vld [vmem:[%s3522_s1 + $0x50] sm:$0xff]  ;;  %v2176_v49 = vld [vmem:[%s3522_s1 + $0x1c8] sm:$0xff]  ;;  %v2127_v53 = vld [vmem:[%s3522_s1 + $0x140] sm:$0xff] }
  0x1d   : > { %2452 = vmatpush.msra.mxu3 %v2110_v8  ;;  %287 = vmatpush.msra.mxu0 %v2110_v8  ;;  %v223_v52 = vld [vmem:[%s3522_s1 + $0x48] sm:$0xff]  ;;  %v2175_v54 = vld [vmem:[%s3522_s1 + $0x1c0] sm:$0xff]  ;;  %v2225_v55 = vld [vmem:[%s3522_s1 + $0x250] sm:$0xff] }
  0x1e   : > { %2453 = vmatpush.msra.mxu1 %v2109_v9  ;;  %2454 = vmatpush.msra.mxu2 %v2109_v9  ;;  %v222_v56 = vld [vmem:[%s3522_s1 + $0x40] sm:$0xff]  ;;  %v2126_v57 = vld [vmem:[%s3522_s1 + $0x138] sm:$0xff]  ;;  %v2224_v60 = vld [vmem:[%s3522_s1 + $0x248] sm:$0xff] }
  0x1f   : > { %2455 = vmatpush.msra.mxu3 %v2109_v9  ;;  %288 = vmatpush.msra.mxu0 %v2109_v9  ;;  %v2702_v58 = vld [vmem:[%s2574_s22 + $0x19] sm:$0xff]  ;;  %v2717_v63 = vld [vmem:[%s2574_s22 + $0xe1] sm:$0xff]  ;;  %v2125_v0 = vld [vmem:[%s3522_s1 + $0x130] sm:$0xff] }
  0x20   : > { %2456 = vmatpush.msra.mxu1 %v2108_v10  ;;  %2457 = vmatpush.msra.mxu2 %v2108_v10  ;;  %v2174_v59 = vld [vmem:[%s3522_s1 + $0x1b8] sm:$0xff]  ;;  %v2173_v1 = vld [vmem:[%s3522_s1 + $0x1b0] sm:$0xff]  ;;  %v257_v2 = vld [vmem:[%s2574_s22 + $0x141] sm:$0xff] }
  0x21   : > { %2458 = vmatpush.msra.mxu3 %v2108_v10  ;;  %289 = vmatpush.msra.mxu0 %v2108_v10  ;;  %v221_v61 = vld [vmem:[%s3522_s1 + $0x38] sm:$0xff]  ;;  %v2223_v3 = vld [vmem:[%s3522_s1 + $0x240] sm:$0xff]  ;;  %v220_v4 = vld [vmem:[%s3522_s1 + $0x30] sm:$0xff] }
  0x22   : > { %2459 = vmatpush.msra.mxu1 %v2107_v11  ;;  %2460 = vmatpush.msra.mxu2 %v2107_v11  ;;  %v2124_v5 = vld [vmem:[%s3522_s1 + $0x128] sm:$0xff]  ;;  %v2222_v7 = vld [vmem:[%s3522_s1 + $0x238] sm:$0xff]  ;;  %v2123_v9 = vld [vmem:[%s3522_s1 + $0x120] sm:$0xff] }
  0x23   : > { %2461 = vmatpush.msra.mxu3 %v2107_v11  ;;  %290 = vmatpush.msra.mxu0 %v2107_v11  ;;  %v2172_v6 = vld [vmem:[%s3522_s1 + $0x1a8] sm:$0xff]  ;;  %v2171_v11 = vld [vmem:[%s3522_s1 + $0x1a0] sm:$0xff] }
  0x24   : > { %2462 = vmatpush.msra.mxu1 %v2106_v12  ;;  %2463 = vmatpush.msra.mxu2 %v2106_v12  ;;  %v219_v8 = vld [vmem:[%s3522_s1 + $0x28] sm:$0xff] }
  0x25   : > { %2464 = vmatpush.msra.mxu3 %v2106_v12  ;;  %291 = vmatpush.msra.mxu0 %v2106_v12  ;;  %v2751_v10 = vld [vmem:[%s2574_s22 + $0x21] sm:$0xff]  ;;  %v2221_v12 = vld [vmem:[%s3522_s1 + $0x230] sm:$0xff] }
  0x26   : > { %2465 = vmatpush.msra.mxu1 %v2105_v13  ;;  %2466 = vmatpush.msra.mxu2 %v2105_v13 }
  0x27   : > { %2467 = vmatpush.msra.mxu3 %v2105_v13  ;;  %292 = vmatpush.msra.mxu0 %v2105_v13  ;;  %v218_v13 = vld [vmem:[%s3522_s1 + $0x20] sm:$0xff] }
  0x28   : > { %2468 = vmatpush.msra.mxu1 %v2104_v14  ;;  %2469 = vmatpush.msra.mxu2 %v2104_v14 }
  0x29   : > { %2470 = vmatpush.msra.mxu3 %v2104_v14  ;;  %293 = vmatpush.msra.mxu0 %v2104_v14  ;;  %v2763_v14 = vld [vmem:[%s2574_s22 + $0x91] sm:$0xff] }
  0x2a   : > { %2471 = vmatpush.msra.mxu1 %v2103_v15  ;;  %2472 = vmatpush.msra.mxu2 %v2103_v15 }
  0x2b   : > { %319 = vmatmul.f32.vlgmr.msra.gmra.mxu1 %v2580_v16  ;;  %343 = vmatmul.f32.vlgmr.msra.gmra.mxu2 %v2583_v17 }
  0x2c   : > { %554 = vmatpush.msrb.mxu2 %v2134_v18  ;;  %2473 = vmatpush.msra.mxu3 %v2103_v15  ;;  %v2122_v18 = vld [vmem:[%s3522_s1 + $0x118] sm:$0xff] }
  0x2d   : > { %367 = vmatmul.f32.vlgmr.msra.gmra.mxu3 %v254_v19  ;;  %392 = vmatpush.msrb.mxu1 %v229_v20  ;;  %v2170_v19 = vld [vmem:[%s3522_s1 + $0x198] sm:$0xff] }
  0x2e   : > { %749 = vmatpush.msrb.mxu3 %v2182_v21  ;;  %555 = vmatpush.msrb.mxu2 %v2133_v22  ;;  %v258_v20 = vld [vmem:[%s2574_s22 + $0x151] sm:$0xff]  ;;  %v2220_v21 = vld [vmem:[%s3522_s1 + $0x228] sm:$0xff] }
  0x2f   : > { %393 = vmatpush.msrb.mxu1 %v228_v23  ;;  %294 = vmatpush.msra.mxu0 %v2103_v15  ;;  %v2766_v15 = vld [vmem:[%s2574_s22 + $0xf1] sm:$0xff] }
  0x30   : > { %750 = vmatpush.msrb.mxu3 %v2181_v24  ;;  %556 = vmatpush.msrb.mxu2 %v2132_v25  ;;  %v217_v22 = vld [vmem:[%s3522_s1 + $0x18] sm:$0xff]  ;;  %v2121_v23 = vld [vmem:[%s3522_s1 + $0x110] sm:$0xff]  ;;  %v2219_v25 = vld [vmem:[%s3522_s1 + $0x220] sm:$0xff] }
  0x31   : > { %295 = vmatmul.f32.vlgmr.msra.gmra.mxu0 %v230_v26  ;;  %394 = vmatpush.msrb.mxu1 %v227_v27  ;;  %v2169_v24 = vld [vmem:[%s3522_s1 + $0x190] sm:$0xff]  ;;  %v2120_v27 = vld [vmem:[%s3522_s1 + $0x108] sm:$0xff] }
  0x32   : > { %751 = vmatpush.msrb.mxu3 %v2180_v28  ;;  %943 = vmatpush.msrb.mxu0 %v2230_v29  ;;  %v216_v26 = vld [vmem:[%s3522_s1 + $0x10] sm:$0xff]  ;;  %v2168_v29 = vld [vmem:[%s3522_s1 + $0x188] sm:$0xff] }
  0x33   : > { %322 = vmatmul.f32.gmra.mxu1 %v2620_v30  ;;  %346 = vmatmul.f32.gmra.mxu2 %v2623_v31  ;;  %v2800_v28 = vld [vmem:[%s2574_s22 + $0x31] sm:$0xff] }
  0x34   : > { %557 = vmatpush.msrb.mxu2 %v2131_v32  ;;  %752 = vmatpush.msrb.mxu3 %v2179_v33  ;;  %v2218_v32 = vld [vmem:[%s3522_s1 + $0x218] sm:$0xff]  ;;  %v215_v33 = vld [vmem:[%s3522_s1 + $0x8] sm:$0xff] }
  0x35   : > { %370 = vmatmul.f32.gmra.mxu3 %v255_v34  ;;  %944 = vmatpush.msrb.mxu0 %v2229_v35  ;;  %v2812_v34 = vld [vmem:[%s2574_s22 + $0x99] sm:$0xff] }
  0x36   : > { %395 = vmatpush.msrb.mxu1 %v226_v36  ;;  %558 = vmatpush.msrb.mxu2 %v2130_v37  ;;  %v2815_v35 = vld [vmem:[%s2574_s22 + $0xf9] sm:$0xff] }
  0x37   : > { %753 = vmatpush.msrb.mxu3 %v2178_v38  ;;  %945 = vmatpush.msrb.mxu0 %v2228_v39  ;;  %v2119_v36 = vld [vmem:[%s3522_s1 + $0x100] sm:$0xff]  ;;  %v2217_v39 = vld [vmem:[%s3522_s1 + $0x210] sm:$0xff] }
  0x38   : > { %396 = vmatpush.msrb.mxu1 %v225_v40  ;;  %559 = vmatpush.msrb.mxu2 %v2129_v41  ;;  %v2167_v37 = vld [vmem:[%s3522_s1 + $0x180] sm:$0xff]  ;;  %v2326_v41 = vld [vmem:[%s3522_s1 + $0x378] sm:$0xff] }
  0x39   : > { %298 = vmatmul.f32.gmra.mxu0 %v231_v42  ;;  %754 = vmatpush.msrb.mxu3 %v2177_v43  ;;  %v259_v38 = vld [vmem:[%s2574_s22 + $0x159] sm:$0xff]  ;;  %v2216_v42 = vld [vmem:[%s3522_s1 + $0x208] sm:$0xff] }
  0x3a   : > { %946 = vmatpush.msrb.mxu0 %v2227_v44  ;;  %397 = vmatpush.msrb.mxu1 %v224_v45  ;;  %v214_v40 = vld [vmem:[%s3522_s1] sm:$0xff]  ;;  %v2374_v43 = vld [vmem:[%s3522_s1 + $0x3f8] sm:$0xff] }
  0x3b   : > { %325 = vmatmul.f32.gmra.mxu1 %v2666_v46  ;;  %349 = vmatmul.f32.gmra.mxu2 %v2669_v47  ;;  %v2278_v44 = vld [vmem:[%s3522_s1 + $0x2f8] sm:$0xff] }
  0x3c   : > { %560 = vmatpush.msrb.mxu2 %v2128_v48  ;;  %755 = vmatpush.msrb.mxu3 %v2176_v49  ;;  %v2846_v45 = vld [vmem:[%s2574_s22 + $0x39] sm:$0xff]  ;;  %v2852_v49 = vld [vmem:[%s2574_s22 + $0xa9] sm:$0xff] }
  0x3d   : > { %373 = vmatmul.f32.gmra.mxu3 %v256_v50  ;;  %947 = vmatpush.msrb.mxu0 %v2226_v51  ;;  %v2215_v48 = vld [vmem:[%s3522_s1 + $0x200] sm:$0xff]  ;;  %v2855_v50 = vld [vmem:[%s2574_s22 + $0x109] sm:$0xff]  ;;  %v2422_v51 = vld [vmem:[%s3522_s1 + $0x478] sm:$0xff] }
  0x3e   : > { %398 = vmatpush.msrb.mxu1 %v223_v52  ;;  %561 = vmatpush.msrb.mxu2 %v2127_v53  ;;  %v260_v52 = vld [vmem:[%s2574_s22 + $0x169] sm:$0xff] }
  0x3f   : > { %756 = vmatpush.msrb.mxu3 %v2175_v54  ;;  %948 = vmatpush.msrb.mxu0 %v2225_v55  ;;  %v2325_v53 = vld [vmem:[%s3522_s1 + $0x370] sm:$0xff] }
  0x40   : > { %399 = vmatpush.msrb.mxu1 %v222_v56  ;;  %562 = vmatpush.msrb.mxu2 %v2126_v57  ;;  %v2373_v54 = vld [vmem:[%s3522_s1 + $0x3f0] sm:$0xff] }
  0x41   : > { %301 = vmatmul.f32.gmra.mxu0 %v2702_v58  ;;  %757 = vmatpush.msrb.mxu3 %v2174_v59  ;;  %v2277_v55 = vld [vmem:[%s3522_s1 + $0x2f0] sm:$0xff] }
  0x42   : > { %949 = vmatpush.msrb.mxu0 %v2224_v60  ;;  %400 = vmatpush.msrb.mxu1 %v221_v61  ;;  %v2874_v56 = vld [vmem:[%s2574_s22 + $0x49] sm:$0xff]  ;;  %v2877_v57 = vld [vmem:[%s2574_s22 + $0xb1] sm:$0xff] }
  0x43   : > { %328 = vmatmul.f32.gmra.mxu1 %v2714_v62  ;;  %352 = vmatmul.f32.gmra.mxu2 %v2717_v63  ;;  %v2880_v59 = vld [vmem:[%s2574_s22 + $0x111] sm:$0xff] }
  0x44   : > { %563 = vmatpush.msrb.mxu2 %v2125_v0  ;;  %758 = vmatpush.msrb.mxu3 %v2173_v1  ;;  %v261_v60 = vld [vmem:[%s2574_s22 + $0x171] sm:$0xff]  ;;  %v182_v1 = vld [vmem:[%s2574_s22] sm:$0xff] }
  0x45   : > { %376 = vmatmul.f32.gmra.mxu3 %v257_v2  ;;  %950 = vmatpush.msrb.mxu0 %v2223_v3  ;;  %v2421_v61 = vld [vmem:[%s3522_s1 + $0x470] sm:$0xff]  ;;  %v505_v2 = vld [vmem:[%s2574_s22 + $0x2] sm:$0xff]  ;;  %v2135_v3 = vld [vmem:[%s2574_s22 + $0x18] sm:$0xff] }
  0x46   : > { %401 = vmatpush.msrb.mxu1 %v220_v4  ;;  %564 = vmatpush.msrb.mxu2 %v2124_v5  ;;  %v2890_v0 = vld [vmem:[%s2574_s22 + $0x51] sm:$0xff]  ;;  %v2324_v4 = vld [vmem:[%s3522_s1 + $0x368] sm:$0xff] }
  0x47   : > { %759 = vmatpush.msrb.mxu3 %v2172_v6  ;;  %951 = vmatpush.msrb.mxu0 %v2222_v7  ;;  %v2372_v5 = vld [vmem:[%s3522_s1 + $0x3e8] sm:$0xff] }
  0x48   : > { %402 = vmatpush.msrb.mxu1 %v219_v8  ;;  %565 = vmatpush.msrb.mxu2 %v2123_v9  ;;  %v2276_v6 = vld [vmem:[%s3522_s1 + $0x2e8] sm:$0xff]  ;;  %v2136_v9 = vld [vmem:[%s2574_s22 + $0x20] sm:$0xff] }
  0x49   : > { %304 = vmatmul.f32.gmra.mxu0 %v2751_v10  ;;  %760 = vmatpush.msrb.mxu3 %v2171_v11  ;;  %v183_v7 = vld [vmem:[%s2574_s22 + $0x8] sm:$0xff] }
  0x4a   : > { %952 = vmatpush.msrb.mxu0 %v2221_v12  ;;  %403 = vmatpush.msrb.mxu1 %v218_v13  ;;  %v506_v8 = vld [vmem:[%s2574_s22 + $0xa] sm:$0xff]  ;;  %v507_v12 = vld [vmem:[%s2574_s22 + $0x1a] sm:$0xff] }
  0x4b   : > { %331 = vmatmul.f32.gmra.mxu1 %v2763_v14  ;;  %355 = vmatmul.f32.gmra.mxu2 %v2766_v15  ;;  %v2420_v11 = vld [vmem:[%s3522_s1 + $0x468] sm:$0xff]  ;;  %v2137_v13 = vld [vmem:[%s2574_s22 + $0x30] sm:$0xff] }
  0x4c   : > { %566 = vmatpush.msrb.mxu2 %v2122_v18  ;;  %761 = vmatpush.msrb.mxu3 %v2170_v19  ;;  %v2371_v18 = vld [vmem:[%s3522_s1 + $0x3e0] sm:$0xff] }
  0x4d   : > { %379 = vmatmul.f32.gmra.mxu3 %v258_v20  ;;  %953 = vmatpush.msrb.mxu0 %v2220_v21  ;;  %v2275_v19 = vld [vmem:[%s3522_s1 + $0x2e0] sm:$0xff]  ;;  %v2138_v20 = vld [vmem:[%s2574_s22 + $0x38] sm:$0xff] }
  0x4e   : > { %404 = vmatpush.msrb.mxu1 %v217_v22  ;;  %567 = vmatpush.msrb.mxu2 %v2121_v23  ;;  %v2419_v21 = vld [vmem:[%s3522_s1 + $0x460] sm:$0xff]  ;;  %v509_v22 = vld [vmem:[%s2574_s22 + $0x32] sm:$0xff]  ;;  %v2139_v23 = vld [vmem:[%s2574_s22 + $0x48] sm:$0xff] }
  0x4f   : > { %762 = vmatpush.msrb.mxu3 %v2169_v24  ;;  %954 = vmatpush.msrb.mxu0 %v2219_v25  ;;  %v2322_v24 = vld [vmem:[%s3522_s1 + $0x358] sm:$0xff] }
  0x50   : > { %405 = vmatpush.msrb.mxu1 %v216_v26  ;;  %568 = vmatpush.msrb.mxu2 %v2120_v27  ;;  %v2370_v25 = vld [vmem:[%s3522_s1 + $0x3d8] sm:$0xff] }
  0x51   : > { %307 = vmatmul.f32.gmra.mxu0 %v2800_v28  ;;  %763 = vmatpush.msrb.mxu3 %v2168_v29  ;;  %v2274_v26 = vld [vmem:[%s3522_s1 + $0x2d8] sm:$0xff] }
  0x52   : > { %955 = vmatpush.msrb.mxu0 %v2218_v32  ;;  %406 = vmatpush.msrb.mxu1 %v215_v33  ;;  %v510_v27 = vld [vmem:[%s2574_s22 + $0x3a] sm:$0xff]  ;;  %v511_v32 = vld [vmem:[%s2574_s22 + $0x4a] sm:$0xff] }
  0x53   : > { %334 = vmatmul.f32.gmra.mxu1 %v2812_v34  ;;  %358 = vmatmul.f32.gmra.mxu2 %v2815_v35  ;;  %v2418_v29 = vld [vmem:[%s3522_s1 + $0x458] sm:$0xff]  ;;  %v2141_v33 = vld [vmem:[%s2574_s22 + $0x60] sm:$0xff] }
  0x54   : > { %569 = vmatpush.msrb.mxu2 %v2119_v36  ;;  %764 = vmatpush.msrb.mxu3 %v2167_v37  ;;  %v2321_v36 = vld [vmem:[%s3522_s1 + $0x350] sm:$0xff] }
  0x55   : > { %382 = vmatmul.f32.gmra.mxu3 %v259_v38  ;;  %956 = vmatpush.msrb.mxu0 %v2217_v39  ;;  %v2369_v37 = vld [vmem:[%s3522_s1 + $0x3d0] sm:$0xff] }
  0x56   : > { %407 = vmatpush.msrb.mxu1 %v214_v40  ;;  %1332 = vmatpush.msra.mxu2 %v2326_v41  ;;  %v2273_v38 = vld [vmem:[%s3522_s1 + $0x2d0] sm:$0xff]  ;;  %v2142_v40 = vld [vmem:[%s2574_s22 + $0x68] sm:$0xff] }
  0x57   : > { %957 = vmatpush.msrb.mxu0 %v2216_v42  ;;  %1526 = vmatpush.msra.mxu3 %v2374_v43  ;;  %v512_v39 = vld [vmem:[%s2574_s22 + $0x52] sm:$0xff]  ;;  %v513_v43 = vld [vmem:[%s2574_s22 + $0x62] sm:$0xff] }
  0x58   : > { %1137 = vmatpush.msra.mxu1 %v2278_v44  ;;  %1333 = vmatpush.msra.mxu2 %v2325_v53  ;;  %v2417_v41 = vld [vmem:[%s3522_s1 + $0x450] sm:$0xff]  ;;  %v2143_v44 = vld [vmem:[%s2574_s22 + $0x78] sm:$0xff] }
  0x59   : > { %310 = vmatmul.f32.gmra.mxu0 %v2846_v45  ;;  %1527 = vmatpush.msra.mxu3 %v2373_v54  ;;  %v514_v54 = vld [vmem:[%s2574_s22 + $0x6a] sm:$0xff] }
  0x5a   : > { %958 = vmatpush.msrb.mxu0 %v2215_v48  ;;  %1138 = vmatpush.msra.mxu1 %v2277_v55  ;;  %v2144_v55 = vld [vmem:[%s2574_s22 + $0x80] sm:$0xff] }
  0x5b   : > { %337 = vmatmul.f32.gmra.mxu1 %v2852_v49  ;;  %361 = vmatmul.f32.gmra.mxu2 %v2855_v50 }
  0x5c   : > { %1720 = vmatpush.msra.mxu0 %v2422_v51  ;;  %1334 = vmatpush.msra.mxu2 %v2324_v4  ;;  %v2367_v4 = vld [vmem:[%s3522_s1 + $0x3c0] sm:$0xff] }
  0x5d   : > { %385 = vmatmul.f32.gmra.mxu3 %v260_v52  ;;  %1139 = vmatpush.msra.mxu1 %v2276_v6 }
  0x5e   : > { %1721 = vmatpush.msra.mxu0 %v2421_v61  ;;  %1528 = vmatpush.msra.mxu3 %v2372_v5 }
  0x5f   : > { %1140 = vmatpush.msra.mxu1 %v2275_v19 }
  0x60   : > { %1722 = vmatpush.msra.mxu0 %v2420_v11  ;;  %1529 = vmatpush.msra.mxu3 %v2371_v18  ;;  %v2146_v11 = vld [vmem:[%s2574_s22 + $0x98] sm:$0xff] }
  0x61   : > { %313 = vmatmul.f32.gmra.mxu0 %v2874_v56  ;;  %1141 = vmatpush.msra.mxu1 %v2274_v26  ;;  %v518_v26 = vld [vmem:[%s2574_s22 + $0x9a] sm:$0xff] }
  0x62   : > { %1723 = vmatpush.msra.mxu0 %v2419_v21  ;;  %1530 = vmatpush.msra.mxu3 %v2370_v25  ;;  %v2366_v21 = vld [vmem:[%s3522_s1 + $0x3b8] sm:$0xff] }
  0x63   : > { %340 = vmatmul.f32.gmra.mxu1 %v2877_v57  ;;  %364 = vmatmul.f32.gmra.mxu2 %v2880_v59 }
  0x64   : > { %1724 = vmatpush.msra.mxu0 %v2418_v29  ;;  %1531 = vmatpush.msra.mxu3 %v2369_v37  ;;  %v519_v37 = vld [vmem:[%s2574_s22 + $0xaa] sm:$0xff] }
  0x65   : > { %388 = vmatmul.f32.gmra.mxu3 %v261_v60  ;;  %1142 = vmatpush.msra.mxu1 %v2273_v38  ;;  %v2317_v38 = vld [vmem:[%s3522_s1 + $0x330] sm:$0xff] }
  0x66   : > { %1725 = vmatpush.msra.mxu0 %v2417_v41 }
  0x69   : > { %316 = vmatmul.f32.gmra.mxu0 %v2890_v0 }
  0x6b   : > { %408 = vmatmul.f32.vlgmr.msrb.gmra.mxu1 %v182_v1  ;;  %570 = vmatmul.f32.vlgmr.msrb.gmra.mxu2 %v505_v2  ;;  %v515_v2 = vld [vmem:[%s2574_s22 + $0x7a] sm:$0xff] }
  0x6d   : > { %765 = vmatmul.f32.vlgmr.msrb.gmra.mxu3 %v2135_v3 }
  0x71   : > { %959 = vmatmul.f32.vlgmr.msrb.gmra.mxu0 %v2702_v58  ;;  %v2323_v58 = vld [vmem:[%s3522_s1 + $0x360] sm:$0xff] }
  0x72   : > { %1335 = vmatpush.msra.mxu2 %v2323_v58 }
  0x73   : > { %411 = vmatmul.f32.gmra.mxu1 %v183_v7  ;;  %573 = vmatmul.f32.gmra.mxu2 %v506_v8 }
  0x74   : > { %1336 = vmatpush.msra.mxu2 %v2322_v24 }
  0x75   : > { %768 = vmatmul.f32.gmra.mxu3 %v2136_v9 }
  0x76   : > { %1337 = vmatpush.msra.mxu2 %v2321_v36 }
  0x79   : > { %962 = vmatmul.f32.gmra.mxu0 %v2751_v10  ;;  %v508_v10 = vld [vmem:[%s2574_s22 + $0x22] sm:$0xff] }
  0x7b   : > { %414 = vmatmul.f32.gmra.mxu1 %v2135_v3  ;;  %576 = vmatmul.f32.gmra.mxu2 %v507_v12  ;;  %v2319_v3 = vld [vmem:[%s3522_s1 + $0x340] sm:$0xff] }
  0x7c   : > { %v2415_v12 = vld [vmem:[%s3522_s1 + $0x440] sm:$0xff] }
  0x7d   : > { %771 = vmatmul.f32.gmra.mxu3 %v2137_v13 }
  0x81   : > { %965 = vmatmul.f32.gmra.mxu0 %v2800_v28  ;;  %v2140_v28 = vld [vmem:[%s2574_s22 + $0x50] sm:$0xff] }
  0x83   : > { %417 = vmatmul.f32.gmra.mxu1 %v2136_v9  ;;  %579 = vmatmul.f32.gmra.mxu2 %v508_v10  ;;  %v516_v9 = vld [vmem:[%s2574_s22 + $0x82] sm:$0xff]  ;;  %v517_v10 = vld [vmem:[%s2574_s22 + $0x92] sm:$0xff] }
  0x85   : > { %774 = vmatmul.f32.gmra.mxu3 %v2138_v20 }
  0x89   : > { %968 = vmatmul.f32.gmra.mxu0 %v2846_v45  ;;  %v2368_v45 = vld [vmem:[%s3522_s1 + $0x3c8] sm:$0xff] }
  0x8a   : > { %1532 = vmatpush.msra.mxu3 %v2368_v45  ;;  %v2150_v45 = vld [vmem:[%s2574_s22 + $0xc8] sm:$0xff] }
  0x8b   : > { %420 = vmatmul.f32.gmra.mxu1 %v2137_v13  ;;  %582 = vmatmul.f32.gmra.mxu2 %v509_v22 }
  0x8c   : > { %1533 = vmatpush.msra.mxu3 %v2367_v4 }
  0x8d   : > { %777 = vmatmul.f32.gmra.mxu3 %v2139_v23 }
  0x8e   : > { %1534 = vmatpush.msra.mxu3 %v2366_v21 }
  0x91   : > { %971 = vmatmul.f32.gmra.mxu0 %v2874_v56  ;;  %v2416_v56 = vld [vmem:[%s3522_s1 + $0x448] sm:$0xff] }
  0x92   : > { %1726 = vmatpush.msra.mxu0 %v2416_v56 }
  0x93   : > { %423 = vmatmul.f32.gmra.mxu1 %v2138_v20  ;;  %585 = vmatmul.f32.gmra.mxu2 %v510_v27  ;;  %v2318_v20 = vld [vmem:[%s3522_s1 + $0x338] sm:$0xff]  ;;  %v2148_v27 = vld [vmem:[%s2574_s22 + $0xb0] sm:$0xff] }
  0x94   : > { %1727 = vmatpush.msra.mxu0 %v2415_v12  ;;  %v2268_v12 = vld [vmem:[%s3522_s1 + $0x2a8] sm:$0xff] }
  0x95   : > { %780 = vmatmul.f32.gmra.mxu3 %v2140_v28 }
  0x99   : > { %974 = vmatmul.f32.gmra.mxu0 %v2890_v0 }
  0x9b   : > { %426 = vmatmul.f32.gmra.mxu1 %v2139_v23  ;;  %588 = vmatmul.f32.gmra.mxu2 %v511_v32 }
  0x9d   : > { %783 = vmatmul.f32.gmra.mxu3 %v2141_v33 }
  0xa1   : > { %977 = vmatmul.f32.gmra.mxu0 %v2580_v16  ;;  %v2320_v16 = vld [vmem:[%s3522_s1 + $0x348] sm:$0xff] }
  0xa2   : > { %1338 = vmatpush.msra.mxu2 %v2320_v16  ;;  %v520_v16 = vld [vmem:[%s2574_s22 + $0xb2] sm:$0xff] }
  0xa3   : > { %429 = vmatmul.f32.gmra.mxu1 %v2140_v28  ;;  %591 = vmatmul.f32.gmra.mxu2 %v512_v39  ;;  %v2414_v28 = vld [vmem:[%s3522_s1 + $0x438] sm:$0xff]  ;;  %v2365_v39 = vld [vmem:[%s3522_s1 + $0x3b0] sm:$0xff] }
  0xa4   : > { %1339 = vmatpush.msra.mxu2 %v2319_v3  ;;  %1728 = vmatpush.msra.mxu0 %v2414_v28  ;;  %v2316_v3 = vld [vmem:[%s3522_s1 + $0x328] sm:$0xff] }
  0xa5   : > { %786 = vmatmul.f32.gmra.mxu3 %v2142_v40 }
  0xa6   : > { %1340 = vmatpush.msra.mxu2 %v2318_v20  ;;  %1535 = vmatpush.msra.mxu3 %v2365_v39  ;;  %v522_v20 = vld [vmem:[%s2574_s22 + $0xca] sm:$0xff] }
  0xa8   : > { %v2966_v42 = vpop.f32.mrf.mxu1  ;;  %1341 = vmatpush.msra.mxu2 %v2317_v38 }
  0xa9   : > { %980 = vmatmul.f32.gmra.mxu0 %v2620_v30  ;;  %v2272_v30 = vld [vmem:[%s3522_s1 + $0x2c8] sm:$0xff] }
  0xaa   : > { %1143 = vmatpush.msra.mxu1 %v2272_v30  ;;  %v2413_v30 = vld [vmem:[%s3522_s1 + $0x430] sm:$0xff]  ;;  %1342 = vmatpush.msra.mxu2 %v2316_v3 }
  0xab   : > { %432 = vmatmul.f32.gmra.mxu1 %v2141_v33  ;;  %594 = vmatmul.f32.gmra.mxu2 %v513_v43 }
  0xac   : > { %1729 = vmatpush.msra.mxu0 %v2413_v30 }
  0xad   : > { %789 = vmatmul.f32.gmra.mxu3 %v2143_v44 }
  0xae   : > { %v2977_v48 = vpop.f32.mrf.mxu2  ;;  %v2979_v51 = vpop.f32.mrf.mxu0 }
  0xb0   : > { %v2984_v52 = vpop.f32.mrf.mxu1  ;;  %v2986_v53 = vpop.f32.mrf.mxu3 }
  0xb1   : > { %983 = vmatmul.f32.gmra.mxu0 %v2666_v46  ;;  %v2145_v46 = vld [vmem:[%s2574_s22 + $0x90] sm:$0xff] }
  0xb3   : > { %435 = vmatmul.f32.gmra.mxu1 %v2142_v40  ;;  %597 = vmatmul.f32.gmra.mxu2 %v514_v54 }
  0xb5   : > { %792 = vmatmul.f32.gmra.mxu3 %v2144_v55 }
  0xb6   : > { %v2994_v60 = vpop.f32.mrf.mxu2  ;;  %v2996_v61 = vpop.f32.mrf.mxu0 }
  0xb8   : > { %v2998_v0 = vpop.f32.mrf.mxu1  ;;  %v3000_v1 = vpop.f32.mrf.mxu3 }
  0xb9   : > { %986 = vmatmul.f32.gmra.mxu0 %v2714_v62  ;;  %v2271_v62 = vld [vmem:[%s3522_s1 + $0x2c0] sm:$0xff] }
  0xba   : > { %1144 = vmatpush.msra.mxu1 %v2271_v62  ;;  %v2364_v62 = vld [vmem:[%s3522_s1 + $0x3a8] sm:$0xff] }
  0xbb   : > { %438 = vmatmul.f32.gmra.mxu1 %v2143_v44  ;;  %600 = vmatmul.f32.gmra.mxu2 %v515_v2 }
  0xbc   : > { %1536 = vmatpush.msra.mxu3 %v2364_v62 }
  0xbd   : > { %795 = vmatmul.f32.gmra.mxu3 %v2145_v46 }
  0xbe   : > { %v3011_v5 = vpop.f32.mrf.mxu2  ;;  %v3013_v6 = vpop.f32.mrf.mxu0 }
  0xc0   : > { %v3018_v7 = vpop.f32.mrf.mxu1  ;;  %v3020_v8 = vpop.f32.mrf.mxu3 }
  0xc1   : > { %989 = vmatmul.f32.gmra.mxu0 %v2763_v14  ;;  %v2147_v14 = vld [vmem:[%s2574_s22 + $0xa8] sm:$0xff] }
  0xc3   : > { %441 = vmatmul.f32.gmra.mxu1 %v2144_v55  ;;  %603 = vmatmul.f32.gmra.mxu2 %v516_v9 }
  0xc5   : > { %798 = vmatmul.f32.gmra.mxu3 %v2146_v11 }
  0xc6   : > { %v3028_v13 = vpop.f32.mrf.mxu2  ;;  %v3030_v58 = vpop.f32.mrf.mxu0 }
  0xc8   : > { %v3032_v18 = vpop.f32.mrf.mxu1  ;;  %v3034_v19 = vpop.f32.mrf.mxu3 }
  0xc9   : > { %992 = vmatmul.f32.gmra.mxu0 %v2812_v34  ;;  %v2270_v34 = vld [vmem:[%s3522_s1 + $0x2b8] sm:$0xff] }
  0xca   : > { %1145 = vmatpush.msra.mxu1 %v2270_v34 }
  0xcb   : > { %444 = vmatmul.f32.gmra.mxu1 %v2145_v46  ;;  %606 = vmatmul.f32.gmra.mxu2 %v517_v10  ;;  %v521_v46 = vld [vmem:[%s2574_s22 + $0xc2] sm:$0xff] }
  0xcd   : > { %801 = vmatmul.f32.gmra.mxu3 %v2147_v14 }
  0xce   : > { %v3045_v22 = vpop.f32.mrf.mxu2  ;;  %v3047_v23 = vpop.f32.mrf.mxu0 }
  0xd0   : > { %v3052_v24 = vpop.f32.mrf.mxu1  ;;  %v3054_v25 = vpop.f32.mrf.mxu3 }
  0xd1   : > { %995 = vmatmul.f32.gmra.mxu0 %v2852_v49  ;;  %v2149_v49 = vld [vmem:[%s2574_s22 + $0xc0] sm:$0xff] }
  0xd3   : > { %447 = vmatmul.f32.gmra.mxu1 %v2146_v11  ;;  %609 = vmatmul.f32.gmra.mxu2 %v518_v26 }
  0xd5   : > { %804 = vmatmul.f32.gmra.mxu3 %v2148_v27 }
  0xd6   : > { %v3062_v29 = vpop.f32.mrf.mxu2  ;;  %v3064_v32 = vpop.f32.mrf.mxu0 }
  0xd8   : > { %v3066_v33 = vpop.f32.mrf.mxu1  ;;  %v3068_v36 = vpop.f32.mrf.mxu3 }
  0xd9   : > { %998 = vmatmul.f32.gmra.mxu0 %v2877_v57  ;;  %v2269_v57 = vld [vmem:[%s3522_s1 + $0x2b0] sm:$0xff] }
  0xda   : > { %1146 = vmatpush.msra.mxu1 %v2269_v57 }
  0xdb   : > { %450 = vmatmul.f32.gmra.mxu1 %v2147_v14  ;;  %612 = vmatmul.f32.gmra.mxu2 %v519_v37 }
  0xdc   : > { %1147 = vmatpush.msra.mxu1 %v2268_v12 }
  0xdd   : > { %807 = vmatmul.f32.gmra.mxu3 %v2149_v49 }
  0xde   : > { %v3079_v40 = vpop.f32.mrf.mxu2  ;;  %v3081_v41 = vpop.f32.mrf.mxu0 }
  0xe0   : > { %v3086_v43 = vpop.f32.mrf.mxu1  ;;  %v3088_v44 = vpop.f32.mrf.mxu3 }
  0xe1   : > { %1001 = vmatmul.f32.gmra.mxu0 %v2583_v17  ;;  %v2151_v17 = vld [vmem:[%s2574_s22 + $0xd8] sm:$0xff] }
  0xe3   : > { %453 = vmatmul.f32.gmra.mxu1 %v2148_v27  ;;  %615 = vmatmul.f32.gmra.mxu2 %v520_v16  ;;  %v2412_v27 = vld [vmem:[%s3522_s1 + $0x428] sm:$0xff]  ;;  %v2153_v16 = vld [vmem:[%s2574_s22 + $0xf0] sm:$0xff] }
  0xe4   : > { %1730 = vmatpush.msra.mxu0 %v2412_v27 }
  0xe5   : > { %810 = vmatmul.f32.gmra.mxu3 %v2150_v45 }
  0xe6   : > { %v3096_v54 = vpop.f32.mrf.mxu2  ;;  %v3098_v55 = vpop.f32.mrf.mxu0 }
  0xe8   : > { %v3100_v56 = vpop.f32.mrf.mxu3  ;;  %v409_v2 = vpop.f32.mrf.mxu1 }
  0xe9   : > { %1004 = vmatmul.f32.gmra.mxu0 %v2623_v31  ;;  %v410_v4 = vadd.f32 %v409_v2, %v2979_v51  ;;  %v2152_v51 = vld [vmem:[%s2574_s22 + $0xe0] sm:$0xff] }
  0xea   : > { %v2363_v2 = vld [vmem:[%s3522_s1 + $0x3a0] sm:$0xff] }
  0xeb   : > { %456 = vmatmul.f32.gmra.mxu1 %v2149_v49  ;;  %618 = vmatmul.f32.gmra.mxu2 %v521_v46 }
  0xec   : > { %1537 = vmatpush.msra.mxu3 %v2363_v2 }
  0xed   : > { %813 = vmatmul.f32.gmra.mxu3 %v2151_v17 }
  0xee   : > { %v571_v9 = vpop.f32.mrf.mxu2  ;;  %v960_v11 = vpop.f32.mrf.mxu0 }
  0xef   : > { %v667_v31 = vadd.f32 %v571_v9, %v410_v4  ;;  %v524_v9 = vld [vmem:[%s2574_s22 + $0xe2] sm:$0xff] }
  0xf0   : > { %v412_v10 = vpop.f32.mrf.mxu1  ;;  %v766_v14 = vpop.f32.mrf.mxu3 }
  0xf1   : > { %v862_v21 = vadd.f32 %v766_v14, %v667_v31  ;;  %1007 = vmatmul.f32.gmra.mxu0 %v2669_v47  ;;  %v413_v26 = vadd.f32 %v412_v10, %v2996_v61  ;;  %v523_v47 = vld [vmem:[%s2574_s22 + $0xda] sm:$0xff] }
  0xf2   : > { %v2315_v61 = vld [vmem:[%s3522_s1 + $0x320] sm:$0xff] }
  0xf3   : > { %v3118_v34 = vadd.f32 %v960_v11, %v862_v21  ;;  %459 = vmatmul.f32.gmra.mxu1 %v2150_v45  ;;  %621 = vmatmul.f32.gmra.mxu2 %v522_v20  ;;  %v2411_v10 = vld [vmem:[%s3522_s1 + $0x420] sm:$0xff] }
  0xf4   : > { %1343 = vmatpush.msra.mxu2 %v2315_v61  ;;  %1731 = vmatpush.msra.mxu0 %v2411_v10 }
  0xf5   : > { %816 = vmatmul.f32.gmra.mxu3 %v2152_v51 }
  0xf6   : > { %v574_v28 = vpop.f32.mrf.mxu2  ;;  %v963_v37 = vpop.f32.mrf.mxu0 }
  0xf7   : > { %v668_v49 = vadd.f32 %v574_v28, %v413_v26 }
  0xf8   : > { %v415_v38 = vpop.f32.mrf.mxu1  ;;  %v769_v39 = vpop.f32.mrf.mxu3 }
  0xf9   : > { %v863_v57 = vadd.f32 %v769_v39, %v668_v49  ;;  %1010 = vmatmul.f32.gmra.mxu0 %v2717_v63  ;;  %v416_v30 = vadd.f32 %v415_v38, %v3013_v6  ;;  %v2154_v6 = vld [vmem:[%s2574_s22 + $0xf8] sm:$0xff] }
  0xfa   : > { %v2362_v38 = vld [vmem:[%s3522_s1 + $0x398] sm:$0xff] }
  0xfb   : > { %v3127_v45 = vadd.f32 %v963_v37, %v863_v57  ;;  %462 = vmatmul.f32.gmra.mxu1 %v2151_v17  ;;  %624 = vmatmul.f32.gmra.mxu2 %v523_v47  ;;  %v2267_v17 = vld [vmem:[%s3522_s1 + $0x2a0] sm:$0xff]  ;;  %v2155_v37 = vld [vmem:[%s2574_s22 + $0x108] sm:$0xff]  ;;  %v2266_v57 = vld [vmem:[%s3522_s1 + $0x298] sm:$0xff] }
  0xfc   : > { %1148 = vmatpush.msra.mxu1 %v2267_v17  ;;  %1538 = vmatpush.msra.mxu3 %v2362_v38 }
  0xfd   : > { %819 = vmatmul.f32.gmra.mxu3 %v2153_v16 }
  0xfe   : > { %v577_v63 = vpop.f32.mrf.mxu2  ;;  %v966_v46 = vpop.f32.mrf.mxu0  ;;  %1149 = vmatpush.msra.mxu1 %v2266_v57 }
  0xff   : > { %v669_v3 = vadd.f32 %v577_v63, %v416_v30  ;;  %v526_v30 = vld [vmem:[%s2574_s22 + $0xfa] sm:$0xff] }
 0x100   : > { %v418_v4 = vpop.f32.mrf.mxu1  ;;  %v772_v62 = vpop.f32.mrf.mxu3 }
 0x101   : > { %v864_v11 = vadd.f32 %v772_v62, %v669_v3  ;;  %1013 = vmatmul.f32.gmra.mxu0 %v2766_v15  ;;  %v419_v12 = vadd.f32 %v418_v4, %v3030_v58  ;;  %v525_v15 = vld [vmem:[%s2574_s22 + $0xf2] sm:$0xff] }
 0x102   : > { %v2314_v58 = vld [vmem:[%s3522_s1 + $0x318] sm:$0xff] }
 0x103   : > { %v3142_v31 = vadd.f32 %v966_v46, %v864_v11  ;;  %465 = vmatmul.f32.gmra.mxu1 %v2152_v51  ;;  %627 = vmatmul.f32.gmra.mxu2 %v524_v9  ;;  %v2410_v3 = vld [vmem:[%s3522_s1 + $0x418] sm:$0xff]  ;;  %v527_v11 = vld [vmem:[%s2574_s22 + $0x10a] sm:$0xff] }
 0x104   : > { %1344 = vmatpush.msra.mxu2 %v2314_v58  ;;  %1732 = vmatpush.msra.mxu0 %v2410_v3  ;;  %v528_v58 = vld [vmem:[%s2574_s22 + $0x112] sm:$0xff] }
 0x105   : > { %822 = vmatmul.f32.gmra.mxu3 %v2154_v6 }
 0x106   : > { %v580_v14 = vpop.f32.mrf.mxu2  ;;  %v969_v20 = vpop.f32.mrf.mxu0 }
 0x107   : > { %v670_v21 = vadd.f32 %v580_v14, %v419_v12 }
 0x108   : > { %v421_v26 = vpop.f32.mrf.mxu1  ;;  %v775_v27 = vpop.f32.mrf.mxu3 }
 0x109   : > { %v865_v28 = vadd.f32 %v775_v27, %v670_v21  ;;  %1016 = vmatmul.f32.gmra.mxu0 %v2815_v35  ;;  %v422_v49 = vadd.f32 %v421_v26, %v3047_v23  ;;  %v2156_v23 = vld [vmem:[%s2574_s22 + $0x110] sm:$0xff]  ;;  %v3185_v26 = vld [vmem:[%s2574_s22 + $0x121] sm:$0xff] }
 0x10b   : > { %v3151_v51 = vadd.f32 %v969_v20, %v865_v28  ;;  %468 = vmatmul.f32.gmra.mxu1 %v2153_v16  ;;  %630 = vmatmul.f32.gmra.mxu2 %v525_v15  ;;  %v2361_v20 = vld [vmem:[%s3522_s1 + $0x390] sm:$0xff] }
 0x10c   : > { %1539 = vmatpush.msra.mxu3 %v2361_v20  ;;  %v2265_v15 = vld [vmem:[%s3522_s1 + $0x290] sm:$0xff] }
 0x10d   : > { %825 = vmatmul.f32.gmra.mxu3 %v2155_v37  ;;  %1150 = vmatpush.msra.mxu1 %v2265_v15  ;;  %v530_v20 = vld [vmem:[%s2574_s22 + $0x12a] sm:$0xff] }
 0x10e   : > { %v583_v35 = vpop.f32.mrf.mxu2  ;;  %v972_v39 = vpop.f32.mrf.mxu0  ;;  %v2408_v15 = vld [vmem:[%s3522_s1 + $0x408] sm:$0xff] }
 0x10f   : > { %v671_v47 = vadd.f32 %v583_v35, %v422_v49  ;;  %v2158_v49 = vld [vmem:[%s2574_s22 + $0x128] sm:$0xff] }
 0x110   : > { %v424_v16 = vpop.f32.mrf.mxu1  ;;  %v778_v61 = vpop.f32.mrf.mxu3 }
 0x111   : > { %v866_v2 = vadd.f32 %v778_v61, %v671_v47  ;;  %1019 = vmatmul.f32.gmra.mxu0 %v2855_v50  ;;  %v425_v46 = vadd.f32 %v424_v16, %v3064_v32  ;;  %v2313_v32 = vld [vmem:[%s3522_s1 + $0x310] sm:$0xff] }
 0x112   : > { %1345 = vmatpush.msra.mxu2 %v2313_v32  ;;  %v3200_v16 = vld [vmem:[%s2574_s22 + $0x129] sm:$0xff] }
 0x113   : > { %v3166_v63 = vadd.f32 %v972_v39, %v866_v2  ;;  %471 = vmatmul.f32.gmra.mxu1 %v2154_v6  ;;  %633 = vmatmul.f32.gmra.mxu2 %v526_v30  ;;  %v2157_v6 = vld [vmem:[%s2574_s22 + $0x120] sm:$0xff]  ;;  %v2409_v39 = vld [vmem:[%s3522_s1 + $0x410] sm:$0xff] }
 0x114   : > { %1733 = vmatpush.msra.mxu0 %v2409_v39 }
 0x115   : > { %828 = vmatmul.f32.gmra.mxu3 %v2156_v23 }
 0x116   : > { %v586_v17 = vpop.f32.mrf.mxu2  ;;  %v975_v4 = vpop.f32.mrf.mxu0  ;;  %1734 = vmatpush.msra.mxu0 %v2408_v15 }
 0x117   : > { %v672_v62 = vadd.f32 %v586_v17, %v425_v46  ;;  %v529_v46 = vld [vmem:[%s2574_s22 + $0x122] sm:$0xff] }
 0x118   : > { %v427_v9 = vpop.f32.mrf.mxu1  ;;  %v781_v50 = vpop.f32.mrf.mxu3  ;;  %v2312_v17 = vld [vmem:[%s3522_s1 + $0x308] sm:$0xff] }
 0x119   : > { %v867_v12 = vadd.f32 %v781_v50, %v672_v62  ;;  %1022 = vmatmul.f32.gmra.mxu0 %v2880_v59  ;;  %v428_v14 = vadd.f32 %v427_v9, %v3081_v41  ;;  %1346 = vmatpush.msra.mxu2 %v2312_v17  ;;  %v2360_v62 = vld [vmem:[%s3522_s1 + $0x388] sm:$0xff]  ;;  %v3245_v17 = vld [vmem:[%s2574_s22 + $0x151] sm:$0xff] }
 0x11a   : > { %1540 = vmatpush.msra.mxu3 %v2360_v62 }
 0x11b   : > { %v3175_v10 = vadd.f32 %v975_v4, %v867_v12  ;;  %474 = vmatmul.f32.gmra.mxu1 %v2155_v37  ;;  %636 = vmatmul.f32.gmra.mxu2 %v527_v11  ;;  %v3215_v11 = vld [vmem:[%s2574_s22 + $0x139] sm:$0xff] }
 0x11d   : > { %831 = vmatmul.f32.gmra.mxu3 %v2157_v6 }
 0x11e   : > { %v589_v59 = vpop.f32.mrf.mxu2  ;;  %v978_v21 = vpop.f32.mrf.mxu0 }
 0x11f   : > { %v673_v27 = vadd.f32 %v589_v59, %v428_v14  ;;  %v2160_v59 = vld [vmem:[%s2574_s22 + $0x140] sm:$0xff] }
 0x120   : > { %v430_v28 = vpop.f32.mrf.mxu1  ;;  %v784_v37 = vpop.f32.mrf.mxu3 }
 0x121   : > { %v868_v41 = vadd.f32 %v784_v37, %v673_v27  ;;  %1025 = vmatmul.f32.gmra.mxu0 %v3185_v26  ;;  %v431_v35 = vadd.f32 %v430_v28, %v3098_v55 }
 0x123   : > { %v3193_v38 = vadd.f32 %v978_v21, %v868_v41  ;;  %477 = vmatmul.f32.gmra.mxu1 %v2156_v23  ;;  %639 = vmatmul.f32.gmra.mxu2 %v528_v58  ;;  %v2159_v23 = vld [vmem:[%s2574_s22 + $0x138] sm:$0xff]  ;;  %v3230_v58 = vld [vmem:[%s2574_s22 + $0x141] sm:$0xff] }
 0x125   : > { %834 = vmatmul.f32.gmra.mxu3 %v2158_v49 }
 0x126   : > { %v592_v47 = vpop.f32.mrf.mxu2  ;;  %v981_v57 = vpop.f32.mrf.mxu0 }
 0x127   : > { %v674_v61 = vadd.f32 %v592_v47, %v431_v35  ;;  %v531_v47 = vld [vmem:[%s2574_s22 + $0x13a] sm:$0xff] }
 0x128   : > { %v433_v30 = vpop.f32.mrf.mxu1  ;;  %v787_v2 = vpop.f32.mrf.mxu3 }
 0x129   : > { %v869_v3 = vadd.f32 %v787_v2, %v674_v61  ;;  %1028 = vmatmul.f32.gmra.mxu0 %v3200_v16  ;;  %v434_v4 = vadd.f32 %v433_v30, %v2966_v42  ;;  %v2311_v61 = vld [vmem:[%s3522_s1 + $0x300] sm:$0xff] }
 0x12a   : > { %1347 = vmatpush.msra.mxu2 %v2311_v61  ;;  %v2359_v2 = vld [vmem:[%s3522_s1 + $0x380] sm:$0xff]  ;;  %v3269_v61 = vld [vmem:[%s2574_s22 + $0x169] sm:$0xff] }
 0x12b   : > { %v3205_v55 = vadd.f32 %v981_v57, %v869_v3  ;;  %480 = vmatmul.f32.gmra.mxu1 %v2157_v6  ;;  %642 = vmatmul.f32.gmra.mxu2 %v529_v46  ;;  %v2264_v6 = vld [vmem:[%s3522_s1 + $0x288] sm:$0xff] }
 0x12c   : > { %1151 = vmatpush.msra.mxu1 %v2264_v6  ;;  %1541 = vmatpush.msra.mxu3 %v2359_v2 }
 0x12d   : > { %837 = vmatmul.f32.gmra.mxu3 %v2159_v23 }
 0x12e   : > { %v595_v9 = vpop.f32.mrf.mxu2  ;;  %v984_v50 = vpop.f32.mrf.mxu0 }
 0x12f   : > { %v675_v12 = vadd.f32 %v595_v9, %v434_v4  ;;  %v2263_v4 = vld [vmem:[%s3522_s1 + $0x280] sm:$0xff] }
 0x130   : > { %v436_v32 = vpop.f32.mrf.mxu1  ;;  %v790_v14 = vpop.f32.mrf.mxu3  ;;  %1152 = vmatpush.msra.mxu1 %v2263_v4  ;;  %v2164_v4 = vld [vmem:[%s2574_s22 + $0x170] sm:$0xff] }
 0x131   : > { %v870_v42 = vadd.f32 %v790_v14, %v675_v12  ;;  %1031 = vmatmul.f32.gmra.mxu0 %v3215_v11  ;;  %v437_v27 = vadd.f32 %v436_v32, %v2984_v52  ;;  %v2162_v12 = vld [vmem:[%s2574_s22 + $0x158] sm:$0xff]  ;;  %v2407_v14 = vld [vmem:[%s3522_s1 + $0x400] sm:$0xff] }
 0x132   : > { %1735 = vmatpush.msra.mxu0 %v2407_v14 }
 0x133   : > { %v3223_v21 = vadd.f32 %v984_v50, %v870_v42  ;;  %483 = vmatmul.f32.gmra.mxu1 %v2158_v49  ;;  %645 = vmatmul.f32.gmra.mxu2 %v530_v20  ;;  %v2161_v49 = vld [vmem:[%s2574_s22 + $0x150] sm:$0xff]  ;;  %v532_v50 = vld [vmem:[%s2574_s22 + $0x142] sm:$0xff] }
 0x135   : > { %840 = vmatmul.f32.gmra.mxu3 %v2160_v59 }
 0x136   : > { %v598_v28 = vpop.f32.mrf.mxu2  ;;  %v987_v37 = vpop.f32.mrf.mxu0 }
 0x137   : > { %v676_v41 = vadd.f32 %v598_v28, %v437_v27  ;;  %v3260_v27 = vld [vmem:[%s2574_s22 + $0x159] sm:$0xff] }
 0x138   : > { %v439_v35 = vpop.f32.mrf.mxu1  ;;  %v793_v39 = vpop.f32.mrf.mxu3 }
 0x139   : > { %v871_v57 = vadd.f32 %v793_v39, %v676_v41  ;;  %1034 = vmatmul.f32.gmra.mxu0 %v3230_v58  ;;  %v440_v30 = vadd.f32 %v439_v35, %v2998_v0  ;;  %v533_v41 = vld [vmem:[%s2574_s22 + $0x152] sm:$0xff] }
 0x13b   : > { %v3235_v52 = vadd.f32 %v987_v37, %v871_v57  ;;  %486 = vmatmul.f32.gmra.mxu1 %v2159_v23  ;;  %648 = vmatmul.f32.gmra.mxu2 %v531_v47 }
 0x13d   : > { %843 = vmatmul.f32.gmra.mxu3 %v2161_v49 }
 0x13e   : > { %v601_v46 = vpop.f32.mrf.mxu2  ;;  %v990_v3 = vpop.f32.mrf.mxu0 }
 0x13f   : > { %v677_v23 = vadd.f32 %v601_v46, %v440_v30 }
 0x140   : > { %v442_v62 = vpop.f32.mrf.mxu1  ;;  %v796_v9 = vpop.f32.mrf.mxu3 }
 0x141   : > { %v872_v0 = vadd.f32 %v796_v9, %v677_v23  ;;  %1037 = vmatmul.f32.gmra.mxu0 %v3245_v17  ;;  %v443_v32 = vadd.f32 %v442_v62, %v3018_v7  ;;  %v2163_v7 = vld [vmem:[%s2574_s22 + $0x168] sm:$0xff] }
 0x143   : > { %v3253_v6 = vadd.f32 %v990_v3, %v872_v0  ;;  %489 = vmatmul.f32.gmra.mxu1 %v2160_v59  ;;  %651 = vmatmul.f32.gmra.mxu2 %v532_v50  ;;  %v534_v3 = vld [vmem:[%s2574_s22 + $0x15a] sm:$0xff]  ;;  %v3278_v50 = vld [vmem:[%s2574_s22 + $0x171] sm:$0xff] }
 0x145   : > { %846 = vmatmul.f32.gmra.mxu3 %v2162_v12 }
 0x146   : > { %v604_v20 = vpop.f32.mrf.mxu2  ;;  %v993_v42 = vpop.f32.mrf.mxu0 }
 0x147   : > { %v678_v15 = vadd.f32 %v604_v20, %v443_v32  ;;  %v535_v20 = vld [vmem:[%s2574_s22 + $0x16a] sm:$0xff] }
 0x148   : > { %v445_v28 = vpop.f32.mrf.mxu1  ;;  %v799_v37 = vpop.f32.mrf.mxu3 }
 0x149   : > { %v873_v59 = vadd.f32 %v799_v37, %v678_v15  ;;  %1040 = vmatmul.f32.gmra.mxu0 %v3260_v27  ;;  %v446_v39 = vadd.f32 %v445_v28, %v3032_v18  ;;  %v2165_v15 = vld [vmem:[%s2574_s22 + $0x180] sm:$0xff] }
 0x14b   : > { %v3265_v35 = vadd.f32 %v993_v42, %v873_v59  ;;  %492 = vmatmul.f32.gmra.mxu1 %v2161_v49  ;;  %654 = vmatmul.f32.gmra.mxu2 %v533_v41  ;;  %v3287_v41 = vld [vmem:[%s2574_s22 + $0x181] sm:$0xff] }
 0x14d   : > { %849 = vmatmul.f32.gmra.mxu3 %v2163_v7 }
 0x14e   : > { %v607_v47 = vpop.f32.mrf.mxu2  ;;  %v996_v57 = vpop.f32.mrf.mxu0 }
 0x14f   : > { %v679_v30 = vadd.f32 %v607_v47, %v446_v39 }
 0x150   : > { %v448_v2 = vpop.f32.mrf.mxu1  ;;  %v802_v46 = vpop.f32.mrf.mxu3 }
 0x151   : > { %v874_v23 = vadd.f32 %v802_v46, %v679_v30  ;;  %1043 = vmatmul.f32.gmra.mxu0 %v3269_v61  ;;  %v449_v18 = vadd.f32 %v448_v2, %v3052_v24  ;;  %v2166_v2 = vld [vmem:[%s2574_s22 + $0x188] sm:$0xff] }
 0x153   : > { %v3274_v49 = vadd.f32 %v996_v57, %v874_v23  ;;  %495 = vmatmul.f32.gmra.mxu1 %v2162_v12  ;;  %657 = vmatmul.f32.gmra.mxu2 %v534_v3  ;;  %v536_v57 = vld [vmem:[%s2574_s22 + $0x172] sm:$0xff]  ;;  %v2214_v23 = vld [vmem:[%s2574_s22 + $0x189] sm:$0xff] }
 0x155   : > { %852 = vmatmul.f32.gmra.mxu3 %v2164_v4 }
 0x156   : > { %v610_v62 = vpop.f32.mrf.mxu2  ;;  %v999_v9 = vpop.f32.mrf.mxu0 }
 0x157   : > { %v680_v0 = vadd.f32 %v610_v62, %v449_v18 }
 0x158   : > { %v451_v32 = vpop.f32.mrf.mxu1  ;;  %v805_v14 = vpop.f32.mrf.mxu3 }
 0x159   : > { %v875_v42 = vadd.f32 %v805_v14, %v680_v0  ;;  %1046 = vmatmul.f32.gmra.mxu0 %v3278_v50  ;;  %v452_v24 = vadd.f32 %v451_v32, %v3066_v33  ;;  %v2231_v0 = vld [vmem:[%s2574_s22 + $0x1a] sm:$0xff]  ;;  %v2279_v32 = vld [vmem:[%s2574_s22 + $0x30] sm:$0xff] }
 0x15b   : > { %v3283_v12 = vadd.f32 %v999_v9, %v875_v42  ;;  %498 = vmatmul.f32.gmra.mxu1 %v2163_v7  ;;  %660 = vmatmul.f32.gmra.mxu2 %v535_v20  ;;  %v2327_v20 = vld [vmem:[%s2574_s22 + $0x31] sm:$0xff] }
 0x15d   : > { %855 = vmatmul.f32.gmra.mxu3 %v2165_v15 }
 0x15e   : > { %v613_v28 = vpop.f32.mrf.mxu2  ;;  %v1002_v37 = vpop.f32.mrf.mxu0 }
 0x15f   : > { %v681_v59 = vadd.f32 %v613_v28, %v452_v24  ;;  %v2375_v24 = vld [vmem:[%s2574_s22 + $0x32] sm:$0xff] }
 0x160   : > { %v454_v39 = vpop.f32.mrf.mxu1  ;;  %v808_v47 = vpop.f32.mrf.mxu3 }
 0x161   : > { %v876_v30 = vadd.f32 %v808_v47, %v681_v59  ;;  %1049 = vmatmul.f32.gmra.mxu0 %v3287_v41  ;;  %v455_v33 = vadd.f32 %v454_v39, %v3086_v43  ;;  %v2232_v39 = vld [vmem:[%s2574_s22 + $0x22] sm:$0xff]  ;;  %v2280_v47 = vld [vmem:[%s2574_s22 + $0x38] sm:$0xff] }
 0x163   : > { %v3292_v7 = vadd.f32 %v1002_v37, %v876_v30  ;;  %501 = vmatmul.f32.gmra.mxu1 %v2164_v4  ;;  %663 = vmatmul.f32.gmra.mxu2 %v536_v57  ;;  %v2328_v30 = vld [vmem:[%s2574_s22 + $0x39] sm:$0xff] }
 0x165   : > { %858 = vmatmul.f32.gmra.mxu3 %v2166_v2 }
 0x166   : > { %v616_v46 = vpop.f32.mrf.mxu2  ;;  %v1005_v3 = vpop.f32.mrf.mxu0 }
 0x167   : > { %v682_v18 = vadd.f32 %v616_v46, %v455_v33 }
 0x168   : > { %v457_v62 = vpop.f32.mrf.mxu1  ;;  %v811_v9 = vpop.f32.mrf.mxu3 }
 0x169   : > { %v877_v14 = vadd.f32 %v811_v9, %v682_v18  ;;  %1052 = vmatmul.f32.gmra.mxu0 %v2214_v23  ;;  %v458_v43 = vadd.f32 %v457_v62, %v2977_v48  ;;  %v2281_v9 = vld [vmem:[%s2574_s22 + $0x48] sm:$0xff] }
 0x16b   : > { %v3299_v4 = vadd.f32 %v1005_v3, %v877_v14  ;;  %1153 = vmatmul.f32.vlgmr.msra.gmra.mxu1 %v2231_v0  ;;  %1348 = vmatmul.f32.vlgmr.msra.gmra.mxu2 %v2279_v32  ;;  %v2376_v3 = vld [vmem:[%s2574_s22 + $0x3a] sm:$0xff]  ;;  %v2329_v32 = vld [vmem:[%s2574_s22 + $0x49] sm:$0xff] }
 0x16d   : > { %1542 = vmatmul.f32.vlgmr.msra.gmra.mxu3 %v2327_v20 }
 0x16e   : > { %v619_v42 = vpop.f32.mrf.mxu2  ;;  %v1008_v15 = vpop.f32.mrf.mxu0 }
 0x16f   : > { %v683_v28 = vadd.f32 %v619_v42, %v458_v43  ;;  %v2377_v42 = vld [vmem:[%s2574_s22 + $0x4a] sm:$0xff] }
 0x170   : > { %v460_v37 = vpop.f32.mrf.mxu1  ;;  %v814_v59 = vpop.f32.mrf.mxu3 }
 0x171   : > { %v878_v57 = vadd.f32 %v814_v59, %v683_v28  ;;  %1736 = vmatmul.f32.vlgmr.msra.gmra.mxu0 %v2375_v24  ;;  %v461_v48 = vadd.f32 %v460_v37, %v2994_v60  ;;  %v2282_v59 = vld [vmem:[%s2574_s22 + $0x50] sm:$0xff] }
 0x173   : > { %v3306_v2 = vadd.f32 %v1008_v15, %v878_v57  ;;  %1156 = vmatmul.f32.gmra.mxu1 %v2232_v39  ;;  %1351 = vmatmul.f32.gmra.mxu2 %v2280_v47  ;;  %v2330_v47 = vld [vmem:[%s2574_s22 + $0x51] sm:$0xff] }
 0x175   : > { %1545 = vmatmul.f32.gmra.mxu3 %v2328_v30 }
 0x176   : > { %v622_v33 = vpop.f32.mrf.mxu2  ;;  %v1011_v46 = vpop.f32.mrf.mxu0 }
 0x177   : > { %v684_v23 = vadd.f32 %v622_v33, %v461_v48  ;;  %v2378_v48 = vld [vmem:[%s2574_s22 + $0x52] sm:$0xff] }
 0x178   : > { %v463_v18 = vpop.f32.mrf.mxu1  ;;  %v817_v62 = vpop.f32.mrf.mxu3 }
 0x179   : > { %v879_v0 = vadd.f32 %v817_v62, %v684_v23  ;;  %1739 = vmatmul.f32.gmra.mxu0 %v2376_v3  ;;  %v464_v60 = vadd.f32 %v463_v18, %v3011_v5  ;;  %v2283_v18 = vld [vmem:[%s2574_s22 + $0x60] sm:$0xff] }
 0x17b   : > { %v3312_v14 = vadd.f32 %v1011_v46, %v879_v0  ;;  %1159 = vmatmul.f32.gmra.mxu1 %v2375_v24  ;;  %1354 = vmatmul.f32.gmra.mxu2 %v2281_v9  ;;  %v2331_v9 = vld [vmem:[%s2574_s22 + $0x61] sm:$0xff] }
 0x17d   : > { %1548 = vmatmul.f32.gmra.mxu3 %v2329_v32 }
 0x17e   : > { %v625_v20 = vpop.f32.mrf.mxu2  ;;  %v1014_v43 = vpop.f32.mrf.mxu0 }
 0x17f   : > { %v685_v15 = vadd.f32 %v625_v20, %v464_v60  ;;  %v2379_v60 = vld [vmem:[%s2574_s22 + $0x62] sm:$0xff] }
 0x180   : > { %v466_v28 = vpop.f32.mrf.mxu1  ;;  %v820_v37 = vpop.f32.mrf.mxu3 }
 0x181   : > { %v880_v39 = vadd.f32 %v820_v37, %v685_v15  ;;  %1742 = vmatmul.f32.gmra.mxu0 %v2377_v42  ;;  %v467_v5 = vadd.f32 %v466_v28, %v3028_v13  ;;  %v2284_v28 = vld [vmem:[%s2574_s22 + $0x68] sm:$0xff] }
 0x183   : > { %v3318_v57 = vadd.f32 %v1014_v43, %v880_v39  ;;  %1162 = vmatmul.f32.gmra.mxu1 %v2376_v3  ;;  %1357 = vmatmul.f32.gmra.mxu2 %v2282_v59  ;;  %v2332_v59 = vld [vmem:[%s2574_s22 + $0x69] sm:$0xff] }
 0x185   : > { %1551 = vmatmul.f32.gmra.mxu3 %v2330_v47 }
 0x186   : > { %v628_v24 = vpop.f32.mrf.mxu2  ;;  %v1017_v30 = vpop.f32.mrf.mxu0 }
 0x187   : > { %v686_v33 = vadd.f32 %v628_v24, %v467_v5  ;;  %v2380_v5 = vld [vmem:[%s2574_s22 + $0x6a] sm:$0xff] }
 0x188   : > { %v469_v46 = vpop.f32.mrf.mxu1  ;;  %v823_v23 = vpop.f32.mrf.mxu3 }
 0x189   : > { %v881_v62 = vadd.f32 %v823_v23, %v686_v33  ;;  %1745 = vmatmul.f32.gmra.mxu0 %v2378_v48  ;;  %v470_v13 = vadd.f32 %v469_v46, %v3045_v22  ;;  %v2285_v46 = vld [vmem:[%s2574_s22 + $0x78] sm:$0xff] }
 0x18b   : > { %v3324_v0 = vadd.f32 %v1017_v30, %v881_v62  ;;  %1165 = vmatmul.f32.gmra.mxu1 %v2377_v42  ;;  %1360 = vmatmul.f32.gmra.mxu2 %v2283_v18  ;;  %v2333_v18 = vld [vmem:[%s2574_s22 + $0x79] sm:$0xff] }
 0x18d   : > { %1554 = vmatmul.f32.gmra.mxu3 %v2331_v9 }
 0x18e   : > { %v631_v3 = vpop.f32.mrf.mxu2  ;;  %v1020_v32 = vpop.f32.mrf.mxu0 }
 0x18f   : > { %v687_v20 = vadd.f32 %v631_v3, %v470_v13  ;;  %v2381_v13 = vld [vmem:[%s2574_s22 + $0x7a] sm:$0xff] }
 0x190   : > { %v472_v43 = vpop.f32.mrf.mxu1  ;;  %v826_v15 = vpop.f32.mrf.mxu3 }
 0x191   : > { %v882_v37 = vadd.f32 %v826_v15, %v687_v20  ;;  %1748 = vmatmul.f32.gmra.mxu0 %v2379_v60  ;;  %v473_v22 = vadd.f32 %v472_v43, %v3062_v29  ;;  %v2286_v43 = vld [vmem:[%s2574_s22 + $0x80] sm:$0xff] }
 0x193   : > { %v3330_v39 = vadd.f32 %v1020_v32, %v882_v37  ;;  %1168 = vmatmul.f32.gmra.mxu1 %v2378_v48  ;;  %1363 = vmatmul.f32.gmra.mxu2 %v2284_v28  ;;  %v2334_v28 = vld [vmem:[%s2574_s22 + $0x81] sm:$0xff] }
 0x195   : > { %1557 = vmatmul.f32.gmra.mxu3 %v2332_v59 }
 0x196   : > { %v634_v42 = vpop.f32.mrf.mxu2  ;;  %v1023_v47 = vpop.f32.mrf.mxu0 }
 0x197   : > { %v688_v24 = vadd.f32 %v634_v42, %v473_v22  ;;  %v2382_v22 = vld [vmem:[%s2574_s22 + $0x82] sm:$0xff] }
 0x198   : > { %v475_v30 = vpop.f32.mrf.mxu1  ;;  %v829_v33 = vpop.f32.mrf.mxu3 }
 0x199   : > { %v883_v23 = vadd.f32 %v829_v33, %v688_v24  ;;  %1751 = vmatmul.f32.gmra.mxu0 %v2380_v5  ;;  %v476_v29 = vadd.f32 %v475_v30, %v3079_v40  ;;  %v2287_v30 = vld [vmem:[%s2574_s22 + $0x90] sm:$0xff] }
 0x19b   : > { %v3336_v62 = vadd.f32 %v1023_v47, %v883_v23  ;;  %1171 = vmatmul.f32.gmra.mxu1 %v2379_v60  ;;  %1366 = vmatmul.f32.gmra.mxu2 %v2285_v46  ;;  %v2335_v46 = vld [vmem:[%s2574_s22 + $0x91] sm:$0xff] }
 0x19d   : > { %1560 = vmatmul.f32.gmra.mxu3 %v2333_v18 }
 0x19e   : > { %v637_v48 = vpop.f32.mrf.mxu2  ;;  %v1026_v9 = vpop.f32.mrf.mxu0 }
 0x19f   : > { %v689_v3 = vadd.f32 %v637_v48, %v476_v29  ;;  %v2383_v29 = vld [vmem:[%s2574_s22 + $0x92] sm:$0xff] }
 0x1a0   : > { %v478_v32 = vpop.f32.mrf.mxu1  ;;  %v832_v20 = vpop.f32.mrf.mxu3 }
 0x1a1   : > { %v884_v15 = vadd.f32 %v832_v20, %v689_v3  ;;  %1754 = vmatmul.f32.gmra.mxu0 %v2381_v13  ;;  %v479_v40 = vadd.f32 %v478_v32, %v3096_v54  ;;  %v2288_v32 = vld [vmem:[%s2574_s22 + $0x98] sm:$0xff] }
 0x1a3   : > { %v3342_v37 = vadd.f32 %v1026_v9, %v884_v15  ;;  %1174 = vmatmul.f32.gmra.mxu1 %v2380_v5  ;;  %1369 = vmatmul.f32.gmra.mxu2 %v2286_v43  ;;  %v2336_v43 = vld [vmem:[%s2574_s22 + $0x99] sm:$0xff] }
 0x1a5   : > { %1563 = vmatmul.f32.gmra.mxu3 %v2334_v28 }
 0x1a6   : > { %v640_v60 = vpop.f32.mrf.mxu2  ;;  %v1029_v59 = vpop.f32.mrf.mxu0 }
 0x1a7   : > { %v690_v42 = vadd.f32 %v640_v60, %v479_v40  ;;  %v2384_v40 = vld [vmem:[%s2574_s22 + $0x9a] sm:$0xff] }
 0x1a8   : > { %v481_v47 = vpop.f32.mrf.mxu1  ;;  %v835_v24 = vpop.f32.mrf.mxu3 }
 0x1a9   : > { %v885_v33 = vadd.f32 %v835_v24, %v690_v42  ;;  %1757 = vmatmul.f32.gmra.mxu0 %v2382_v22  ;;  %v482_v54 = vadd.f32 %v481_v47, %v2986_v53  ;;  %v2289_v47 = vld [vmem:[%s2574_s22 + $0xa8] sm:$0xff] }
 0x1ab   : > { %v3348_v23 = vadd.f32 %v1029_v59, %v885_v33  ;;  %1177 = vmatmul.f32.gmra.mxu1 %v2381_v13  ;;  %1372 = vmatmul.f32.gmra.mxu2 %v2287_v30  ;;  %v2337_v30 = vld [vmem:[%s2574_s22 + $0xa9] sm:$0xff] }
 0x1ad   : > { %1566 = vmatmul.f32.gmra.mxu3 %v2335_v46 }
 0x1ae   : > { %v643_v5 = vpop.f32.mrf.mxu2  ;;  %v1032_v18 = vpop.f32.mrf.mxu0 }
 0x1af   : > { %v691_v48 = vadd.f32 %v643_v5, %v482_v54  ;;  %v2385_v54 = vld [vmem:[%s2574_s22 + $0xaa] sm:$0xff] }
 0x1b0   : > { %v484_v9 = vpop.f32.mrf.mxu1  ;;  %v838_v3 = vpop.f32.mrf.mxu3 }
 0x1b1   : > { %v886_v20 = vadd.f32 %v838_v3, %v691_v48  ;;  %1760 = vmatmul.f32.gmra.mxu0 %v2383_v29  ;;  %v485_v53 = vadd.f32 %v484_v9, %v3000_v1  ;;  %v2290_v9 = vld [vmem:[%s2574_s22 + $0xb0] sm:$0xff] }
 0x1b3   : > { %v3354_v15 = vadd.f32 %v1032_v18, %v886_v20  ;;  %1180 = vmatmul.f32.gmra.mxu1 %v2382_v22  ;;  %1375 = vmatmul.f32.gmra.mxu2 %v2288_v32  ;;  %v2338_v32 = vld [vmem:[%s2574_s22 + $0xb1] sm:$0xff] }
 0x1b5   : > { %1569 = vmatmul.f32.gmra.mxu3 %v2336_v43 }
 0x1b6   : > { %v646_v13 = vpop.f32.mrf.mxu2  ;;  %v1035_v28 = vpop.f32.mrf.mxu0 }
 0x1b7   : > { %v692_v60 = vadd.f32 %v646_v13, %v485_v53  ;;  %v2386_v53 = vld [vmem:[%s2574_s22 + $0xb2] sm:$0xff] }
 0x1b8   : > { %v487_v59 = vpop.f32.mrf.mxu1  ;;  %v841_v42 = vpop.f32.mrf.mxu3 }
 0x1b9   : > { %v887_v24 = vadd.f32 %v841_v42, %v692_v60  ;;  %1763 = vmatmul.f32.gmra.mxu0 %v2384_v40  ;;  %v488_v1 = vadd.f32 %v487_v59, %v3020_v8  ;;  %v2291_v59 = vld [vmem:[%s2574_s22 + $0xc0] sm:$0xff] }
 0x1bb   : > { %v3360_v33 = vadd.f32 %v1035_v28, %v887_v24  ;;  %1183 = vmatmul.f32.gmra.mxu1 %v2383_v29  ;;  %1378 = vmatmul.f32.gmra.mxu2 %v2289_v47  ;;  %v2339_v47 = vld [vmem:[%s2574_s22 + $0xc1] sm:$0xff] }
 0x1bd   : > { %1572 = vmatmul.f32.gmra.mxu3 %v2337_v30 }
 0x1be   : > { %v649_v22 = vpop.f32.mrf.mxu2  ;;  %v1038_v46 = vpop.f32.mrf.mxu0 }
 0x1bf   : > { %v693_v5 = vadd.f32 %v649_v22, %v488_v1  ;;  %v2387_v1 = vld [vmem:[%s2574_s22 + $0xc2] sm:$0xff] }
 0x1c0   : > { %v490_v18 = vpop.f32.mrf.mxu1  ;;  %v844_v48 = vpop.f32.mrf.mxu3 }
 0x1c1   : > { %v888_v3 = vadd.f32 %v844_v48, %v693_v5  ;;  %1766 = vmatmul.f32.gmra.mxu0 %v2385_v54  ;;  %v491_v8 = vadd.f32 %v490_v18, %v3034_v19  ;;  %v2292_v18 = vld [vmem:[%s2574_s22 + $0xc8] sm:$0xff] }
 0x1c3   : > { %v3366_v20 = vadd.f32 %v1038_v46, %v888_v3  ;;  %1186 = vmatmul.f32.gmra.mxu1 %v2384_v40  ;;  %1381 = vmatmul.f32.gmra.mxu2 %v2290_v9  ;;  %v2340_v9 = vld [vmem:[%s2574_s22 + $0xc9] sm:$0xff] }
 0x1c5   : > { %1575 = vmatmul.f32.gmra.mxu3 %v2338_v32 }
 0x1c6   : > { %v652_v29 = vpop.f32.mrf.mxu2  ;;  %v1041_v43 = vpop.f32.mrf.mxu0 }
 0x1c7   : > { %v694_v13 = vadd.f32 %v652_v29, %v491_v8  ;;  %v2388_v8 = vld [vmem:[%s2574_s22 + $0xca] sm:$0xff] }
 0x1c8   : > { %v493_v28 = vpop.f32.mrf.mxu1  ;;  %v847_v60 = vpop.f32.mrf.mxu3 }
 0x1c9   : > { %v889_v42 = vadd.f32 %v847_v60, %v694_v13  ;;  %1769 = vmatmul.f32.gmra.mxu0 %v2386_v53  ;;  %v494_v19 = vadd.f32 %v493_v28, %v3054_v25  ;;  %v2293_v28 = vld [vmem:[%s2574_s22 + $0xd8] sm:$0xff] }
 0x1cb   : > { %v3372_v24 = vadd.f32 %v1041_v43, %v889_v42  ;;  %1189 = vmatmul.f32.gmra.mxu1 %v2385_v54  ;;  %1384 = vmatmul.f32.gmra.mxu2 %v2291_v59  ;;  %v2341_v59 = vld [vmem:[%s2574_s22 + $0xd9] sm:$0xff] }
 0x1cd   : > { %1578 = vmatmul.f32.gmra.mxu3 %v2339_v47 }
 0x1ce   : > { %v655_v40 = vpop.f32.mrf.mxu2  ;;  %v1044_v30 = vpop.f32.mrf.mxu0 }
 0x1cf   : > { %v695_v22 = vadd.f32 %v655_v40, %v494_v19  ;;  %v2389_v19 = vld [vmem:[%s2574_s22 + $0xda] sm:$0xff] }
 0x1d0   : > { %v496_v46 = vpop.f32.mrf.mxu1  ;;  %v850_v5 = vpop.f32.mrf.mxu3 }
 0x1d1   : > { %v890_v48 = vadd.f32 %v850_v5, %v695_v22  ;;  %1772 = vmatmul.f32.gmra.mxu0 %v2387_v1  ;;  %v497_v25 = vadd.f32 %v496_v46, %v3068_v36  ;;  %v2294_v46 = vld [vmem:[%s2574_s22 + $0xe0] sm:$0xff] }
 0x1d3   : > { %v3378_v3 = vadd.f32 %v1044_v30, %v890_v48  ;;  %1192 = vmatmul.f32.gmra.mxu1 %v2386_v53  ;;  %1387 = vmatmul.f32.gmra.mxu2 %v2292_v18  ;;  %v2342_v18 = vld [vmem:[%s2574_s22 + $0xe1] sm:$0xff] }
 0x1d5   : > { %1581 = vmatmul.f32.gmra.mxu3 %v2340_v9 }
 0x1d6   : > { %v658_v54 = vpop.f32.mrf.mxu2  ;;  %v1047_v32 = vpop.f32.mrf.mxu0 }
 0x1d7   : > { %v696_v29 = vadd.f32 %v658_v54, %v497_v25  ;;  %v2390_v25 = vld [vmem:[%s2574_s22 + $0xe2] sm:$0xff] }
 0x1d8   : > { %v499_v43 = vpop.f32.mrf.mxu1  ;;  %v853_v13 = vpop.f32.mrf.mxu3 }
 0x1d9   : > { %v891_v60 = vadd.f32 %v853_v13, %v696_v29  ;;  %1775 = vmatmul.f32.gmra.mxu0 %v2388_v8  ;;  %v500_v36 = vadd.f32 %v499_v43, %v3088_v44  ;;  %v2295_v43 = vld [vmem:[%s2574_s22 + $0xf0] sm:$0xff] }
 0x1db   : > { %v3384_v42 = vadd.f32 %v1047_v32, %v891_v60  ;;  %1195 = vmatmul.f32.gmra.mxu1 %v2387_v1  ;;  %1390 = vmatmul.f32.gmra.mxu2 %v2293_v28  ;;  %v2343_v28 = vld [vmem:[%s2574_s22 + $0xf1] sm:$0xff] }
 0x1dd   : > { %1584 = vmatmul.f32.gmra.mxu3 %v2341_v59 }
 0x1de   : > { %v661_v53 = vpop.f32.mrf.mxu2  ;;  %v1050_v47 = vpop.f32.mrf.mxu0 }
 0x1df   : > { %v697_v40 = vadd.f32 %v661_v53, %v500_v36  ;;  %v2391_v36 = vld [vmem:[%s2574_s22 + $0xf2] sm:$0xff] }
 0x1e0   : > { %v502_v30 = vpop.f32.mrf.mxu1  ;;  %v856_v22 = vpop.f32.mrf.mxu3 }
 0x1e1   : > { %v892_v5 = vadd.f32 %v856_v22, %v697_v40  ;;  %1778 = vmatmul.f32.gmra.mxu0 %v2389_v19  ;;  %v503_v44 = vadd.f32 %v502_v30, %v3100_v56  ;;  %v2296_v30 = vld [vmem:[%s2574_s22 + $0xf8] sm:$0xff] }
 0x1e3   : > { %v3390_v48 = vadd.f32 %v1050_v47, %v892_v5  ;;  %1198 = vmatmul.f32.gmra.mxu1 %v2388_v8  ;;  %1393 = vmatmul.f32.gmra.mxu2 %v2294_v46 }
 0x1e5   : > { %1587 = vmatmul.f32.gmra.mxu3 %v2342_v18 }
 0x1e6   : > { %v664_v1 = vpop.f32.mrf.mxu2  ;;  %v1053_v9 = vpop.f32.mrf.mxu0 }
 0x1e7   : > { %v698_v54 = vadd.f32 %v664_v1, %v503_v44  ;;  %v2392_v44 = vld [vmem:[%s2574_s22 + $0xfa] sm:$0xff] }
 0x1e8   : > { %v859_v32 = vpop.f32.mrf.mxu3  ;;  %v1154_v29 = vpop.f32.mrf.mxu1 }
 0x1e9   : > { %v893_v13 = vadd.f32 %v859_v32, %v698_v54  ;;  %1781 = vmatmul.f32.gmra.mxu0 %v2390_v25  ;;  %v1250_v56 = vadd.f32 %v1154_v29, %v3118_v34  ;;  %v2344_v34 = vld [vmem:[%s2574_s22 + $0xf9] sm:$0xff]  ;;  %v2297_v32 = vld [vmem:[%s2574_s22 + $0x108] sm:$0xff] }
 0x1eb   : > { %v3396_v60 = vadd.f32 %v1053_v9, %v893_v13  ;;  %1201 = vmatmul.f32.gmra.mxu1 %v2389_v19  ;;  %1396 = vmatmul.f32.gmra.mxu2 %v2295_v43  ;;  %v2345_v43 = vld [vmem:[%s2574_s22 + $0x109] sm:$0xff] }
 0x1ed   : > { %1590 = vmatmul.f32.gmra.mxu3 %v2343_v28 }
 0x1ee   : > { %v1349_v8 = vpop.f32.mrf.mxu2  ;;  %v1737_v59 = vpop.f32.mrf.mxu0 }
 0x1ef   : > { %v1445_v53 = vadd.f32 %v1349_v8, %v1250_v56 }
 0x1f0   : > { %v1157_v47 = vpop.f32.mrf.mxu1  ;;  %v1543_v40 = vpop.f32.mrf.mxu3 }
 0x1f1   : > { %v1639_v22 = vadd.f32 %v1543_v40, %v1445_v53  ;;  %1784 = vmatmul.f32.gmra.mxu0 %v2391_v36  ;;  %v1251_v46 = vadd.f32 %v1157_v47, %v3127_v45  ;;  %v2393_v53 = vld [vmem:[%s2574_s22 + $0x10a] sm:$0xff] }
 0x1f3   : > { %v1833_v19 = vadd.f32 %v1737_v59, %v1639_v22  ;;  %1204 = vmatmul.f32.gmra.mxu1 %v2390_v25  ;;  %1399 = vmatmul.f32.gmra.mxu2 %v2296_v30 }
 0x1f5   : > { %1865 = vst [vmem:[%s3405_s19] sm:$0xff] %v1833_v19  ;;  %1593 = vmatmul.f32.gmra.mxu3 %v2344_v34  ;;  %v1934_v25 = vmul.f32 %v1833_v19, %v1833_v19  ;;  %v2298_v34 = vld [vmem:[%s2574_s22 + $0x110] sm:$0xff] }
 0x1f6   : > { %v1352_v5 = vpop.f32.mrf.mxu2  ;;  %v1740_v18 = vpop.f32.mrf.mxu0 }
 0x1f7   : > { %v1446_v1 = vadd.f32 %v1352_v5, %v1251_v46  ;;  %v2346_v46 = vld [vmem:[%s2574_s22 + $0x111] sm:$0xff] }
 0x1f8   : > { %v1160_v9 = vpop.f32.mrf.mxu1  ;;  %v1546_v54 = vpop.f32.mrf.mxu3 }
 0x1f9   : > { %v1640_v29 = vadd.f32 %v1546_v54, %v1446_v1  ;;  %1787 = vmatmul.f32.gmra.mxu0 %v2392_v44  ;;  %v1252_v45 = vadd.f32 %v1160_v9, %v3142_v31  ;;  %v2394_v54 = vld [vmem:[%s2574_s22 + $0x112] sm:$0xff] }
 0x1fb   : > { %v1834_v13 = vadd.f32 %v1740_v18, %v1640_v29  ;;  %1207 = vmatmul.f32.gmra.mxu1 %v2391_v36  ;;  %1402 = vmatmul.f32.gmra.mxu2 %v2297_v32 }
 0x1fd   : > { %1866 = vst [vmem:[%s3405_s19 + $0x8] sm:$0xff] %v1834_v13  ;;  %v1897_v28 = vadd.f32 %v1834_v13, %v1833_v19  ;;  %v1935_v56 = vmul.f32 %v1834_v13, %v1834_v13  ;;  %1596 = vmatmul.f32.gmra.mxu3 %v2345_v43 }
 0x1fe   : > { %v1355_v8 = vpop.f32.mrf.mxu2  ;;  %v1743_v59 = vpop.f32.mrf.mxu0 }
 0x1ff   : > { %v1966_v47 = vadd.f32 %v1935_v56, %v1934_v25  ;;  %v1447_v40 = vadd.f32 %v1355_v8, %v1252_v45  ;;  %v2299_v25 = vld [vmem:[%s2574_s22 + $0x120] sm:$0xff] }
 0x200   : > { %v1163_v30 = vpop.f32.mrf.mxu1  ;;  %v1549_v22 = vpop.f32.mrf.mxu3 }
 0x201   : > { %v1641_v36 = vadd.f32 %v1549_v22, %v1447_v40  ;;  %1790 = vmatmul.f32.gmra.mxu0 %v2393_v53  ;;  %v1253_v31 = vadd.f32 %v1163_v30, %v3151_v51 }
 0x203   : > { %v1835_v5 = vadd.f32 %v1743_v59, %v1641_v36  ;;  %1210 = vmatmul.f32.gmra.mxu1 %v2392_v44  ;;  %1405 = vmatmul.f32.gmra.mxu2 %v2298_v34  ;;  %v2300_v36 = vld [vmem:[%s2574_s22 + $0x128] sm:$0xff] }
 0x205   : > { %1867 = vst [vmem:[%s3405_s19 + $0x10] sm:$0xff] %v1835_v5  ;;  %v1898_v19 = vadd.f32 %v1897_v28, %v1835_v5  ;;  %v1936_v18 = vmul.f32 %v1835_v5, %v1835_v5  ;;  %1599 = vmatmul.f32.gmra.mxu3 %v2346_v46 }
 0x206   : > { %v1358_v1 = vpop.f32.mrf.mxu2  ;;  %v1746_v9 = vpop.f32.mrf.mxu0 }
 0x207   : > { %v1967_v32 = vadd.f32 %v1966_v47, %v1936_v18  ;;  %v1448_v29 = vadd.f32 %v1358_v1, %v1253_v31  ;;  %v2395_v47 = vld [vmem:[%s2574_s22 + $0x122] sm:$0xff]  ;;  %v2396_v18 = vld [vmem:[%s2574_s22 + $0x12a] sm:$0xff] }
 0x208   : > { %v1166_v43 = vpop.f32.mrf.mxu1  ;;  %v1552_v13 = vpop.f32.mrf.mxu3 }
 0x209   : > { %v1642_v45 = vadd.f32 %v1552_v13, %v1448_v29  ;;  %1793 = vmatmul.f32.gmra.mxu0 %v2394_v54  ;;  %v1254_v51 = vadd.f32 %v1166_v43, %v3166_v63  ;;  %v2301_v43 = vld [vmem:[%s2574_s22 + $0x138] sm:$0xff] }
 0x20b   : > { %v1836_v44 = vadd.f32 %v1746_v9, %v1642_v45  ;;  %1213 = vmatmul.f32.gmra.mxu1 %v2393_v53  ;;  %1408 = vmatmul.f32.gmra.mxu2 %v2299_v25 }
 0x20d   : > { %1868 = vst [vmem:[%s3405_s19 + $0x18] sm:$0xff] %v1836_v44  ;;  %v1899_v28 = vadd.f32 %v1898_v19, %v1836_v44  ;;  %v1937_v56 = vmul.f32 %v1836_v44, %v1836_v44  ;;  %1602 = vmatmul.f32.gmra.mxu3 %v3185_v26 }
 0x20e   : > { %v1361_v8 = vpop.f32.mrf.mxu2  ;;  %v1749_v59 = vpop.f32.mrf.mxu0 }
 0x20f   : > { %v1968_v40 = vadd.f32 %v1967_v32, %v1937_v56  ;;  %v1449_v30 = vadd.f32 %v1361_v8, %v1254_v51  ;;  %v2397_v51 = vld [vmem:[%s2574_s22 + $0x13a] sm:$0xff] }
 0x210   : > { %v1169_v22 = vpop.f32.mrf.mxu1  ;;  %v1555_v34 = vpop.f32.mrf.mxu3 }
 0x211   : > { %v1643_v46 = vadd.f32 %v1555_v34, %v1449_v30  ;;  %1796 = vmatmul.f32.gmra.mxu0 %v2395_v47  ;;  %v1255_v63 = vadd.f32 %v1169_v22, %v3175_v10 }
 0x213   : > { %v1837_v53 = vadd.f32 %v1749_v59, %v1643_v46  ;;  %1216 = vmatmul.f32.gmra.mxu1 %v2394_v54  ;;  %1411 = vmatmul.f32.gmra.mxu2 %v2300_v36  ;;  %v2398_v46 = vld [vmem:[%s2574_s22 + $0x142] sm:$0xff] }
 0x215   : > { %1869 = vst [vmem:[%s3405_s19 + $0x20] sm:$0xff] %v1837_v53  ;;  %v1900_v5 = vadd.f32 %v1899_v28, %v1837_v53  ;;  %v1938_v26 = vmul.f32 %v1837_v53, %v1837_v53  ;;  %1605 = vmatmul.f32.gmra.mxu3 %v3200_v16 }
 0x216   : > { %v1364_v31 = vpop.f32.mrf.mxu2  ;;  %v1752_v19 = vpop.f32.mrf.mxu0 }
 0x217   : > { %v1969_v1 = vadd.f32 %v1968_v40, %v1938_v26  ;;  %v1450_v9 = vadd.f32 %v1364_v31, %v1255_v63  ;;  %v2302_v40 = vld [vmem:[%s2574_s22 + $0x140] sm:$0xff]  ;;  %v2303_v31 = vld [vmem:[%s2574_s22 + $0x150] sm:$0xff] }
 0x218   : > { %v1172_v32 = vpop.f32.mrf.mxu1  ;;  %v1558_v29 = vpop.f32.mrf.mxu3 }
 0x219   : > { %v1644_v13 = vadd.f32 %v1558_v29, %v1450_v9  ;;  %1799 = vmatmul.f32.gmra.mxu0 %v2396_v18  ;;  %v1256_v10 = vadd.f32 %v1172_v32, %v3193_v38  ;;  %v2399_v29 = vld [vmem:[%s2574_s22 + $0x152] sm:$0xff] }
 0x21b   : > { %v1838_v54 = vadd.f32 %v1752_v19, %v1644_v13  ;;  %1219 = vmatmul.f32.gmra.mxu1 %v2395_v47  ;;  %1414 = vmatmul.f32.gmra.mxu2 %v2301_v43 }
 0x21d   : > { %1870 = vst [vmem:[%s3405_s19 + $0x28] sm:$0xff] %v1838_v54  ;;  %v1901_v25 = vadd.f32 %v1900_v5, %v1838_v54  ;;  %v1939_v16 = vmul.f32 %v1838_v54, %v1838_v54  ;;  %1608 = vmatmul.f32.gmra.mxu3 %v3215_v11 }
 0x21e   : > { %v1367_v45 = vpop.f32.mrf.mxu2  ;;  %v1755_v44 = vpop.f32.mrf.mxu0 }
 0x21f   : > { %v1970_v28 = vadd.f32 %v1969_v1, %v1939_v16  ;;  %v1451_v56 = vadd.f32 %v1367_v45, %v1256_v10 }
 0x220   : > { %v1175_v8 = vpop.f32.mrf.mxu1  ;;  %v1561_v59 = vpop.f32.mrf.mxu3 }
 0x221   : > { %v1645_v30 = vadd.f32 %v1561_v59, %v1451_v56  ;;  %1802 = vmatmul.f32.gmra.mxu0 %v2397_v51  ;;  %v1257_v38 = vadd.f32 %v1175_v8, %v3205_v55  ;;  %v2400_v56 = vld [vmem:[%s2574_s22 + $0x15a] sm:$0xff] }
 0x223   : > { %v1839_v47 = vadd.f32 %v1755_v44, %v1645_v30  ;;  %1222 = vmatmul.f32.gmra.mxu1 %v2396_v18  ;;  %1417 = vmatmul.f32.gmra.mxu2 %v2302_v40 }
 0x225   : > { %1871 = vst [vmem:[%s3405_s19 + $0x30] sm:$0xff] %v1839_v47  ;;  %v1902_v22 = vadd.f32 %v1901_v25, %v1839_v47  ;;  %v1940_v11 = vmul.f32 %v1839_v47, %v1839_v47  ;;  %1611 = vmatmul.f32.gmra.mxu3 %v3230_v58  ;;  %v2304_v25 = vld [vmem:[%s2574_s22 + $0x158] sm:$0xff]  ;;  %v2305_v47 = vld [vmem:[%s2574_s22 + $0x168] sm:$0xff] }
 0x226   : > { %v1370_v34 = vpop.f32.mrf.mxu2  ;;  %v1758_v36 = vpop.f32.mrf.mxu0 }
 0x227   : > { %v1971_v53 = vadd.f32 %v1970_v28, %v1940_v11  ;;  %v1452_v63 = vadd.f32 %v1370_v34, %v1257_v38 }
 0x228   : > { %v1178_v5 = vpop.f32.mrf.mxu1  ;;  %v1564_v26 = vpop.f32.mrf.mxu3 }
 0x229   : > { %v1646_v19 = vadd.f32 %v1564_v26, %v1452_v63  ;;  %1805 = vmatmul.f32.gmra.mxu0 %v2398_v46  ;;  %v1258_v55 = vadd.f32 %v1178_v5, %v3223_v21 }
 0x22b   : > { %v1840_v18 = vadd.f32 %v1758_v36, %v1646_v19  ;;  %1225 = vmatmul.f32.gmra.mxu1 %v2397_v51  ;;  %1420 = vmatmul.f32.gmra.mxu2 %v2303_v31  ;;  %v2306_v31 = vld [vmem:[%s2574_s22 + $0x170] sm:$0xff] }
 0x22d   : > { %1872 = vst [vmem:[%s3405_s19 + $0x38] sm:$0xff] %v1840_v18  ;;  %v1903_v1 = vadd.f32 %v1902_v22, %v1840_v18  ;;  %v1941_v58 = vmul.f32 %v1840_v18, %v1840_v18  ;;  %1614 = vmatmul.f32.gmra.mxu3 %v3245_v17 }
 0x22e   : > { %v1373_v9 = vpop.f32.mrf.mxu2  ;;  %v1761_v32 = vpop.f32.mrf.mxu0 }
 0x22f   : > { %v1972_v43 = vadd.f32 %v1971_v53, %v1941_v58  ;;  %v1453_v13 = vadd.f32 %v1373_v9, %v1258_v55  ;;  %v2402_v9 = vld [vmem:[%s2574_s22 + $0x172] sm:$0xff] }
 0x230   : > { %v1181_v54 = vpop.f32.mrf.mxu1  ;;  %v1567_v10 = vpop.f32.mrf.mxu3 }
 0x231   : > { %v1647_v16 = vadd.f32 %v1567_v10, %v1453_v13  ;;  %1808 = vmatmul.f32.gmra.mxu0 %v2399_v29  ;;  %v1259_v21 = vadd.f32 %v1181_v54, %v3235_v52  ;;  %v2307_v54 = vld [vmem:[%s2574_s22 + $0x180] sm:$0xff] }
 0x233   : > { %v1841_v45 = vadd.f32 %v1761_v32, %v1647_v16  ;;  %1228 = vmatmul.f32.gmra.mxu1 %v2398_v46  ;;  %1423 = vmatmul.f32.gmra.mxu2 %v2304_v25  ;;  %v2401_v46 = vld [vmem:[%s2574_s22 + $0x16a] sm:$0xff] }
 0x235   : > { %1873 = vst [vmem:[%s3405_s19 + $0x40] sm:$0xff] %v1841_v45  ;;  %v1904_v44 = vadd.f32 %v1903_v1, %v1841_v45  ;;  %v1942_v17 = vmul.f32 %v1841_v45, %v1841_v45  ;;  %1617 = vmatmul.f32.gmra.mxu3 %v3260_v27 }
 0x236   : > { %v1376_v51 = vpop.f32.mrf.mxu2  ;;  %v1764_v28 = vpop.f32.mrf.mxu0 }
 0x237   : > { %v1973_v8 = vadd.f32 %v1972_v43, %v1942_v17  ;;  %v1454_v59 = vadd.f32 %v1376_v51, %v1259_v21 }
 0x238   : > { %v1184_v40 = vpop.f32.mrf.mxu1  ;;  %v1570_v30 = vpop.f32.mrf.mxu3 }
 0x239   : > { %v1648_v38 = vadd.f32 %v1570_v30, %v1454_v59  ;;  %1811 = vmatmul.f32.gmra.mxu0 %v2400_v56  ;;  %v1260_v52 = vadd.f32 %v1184_v40, %v3253_v6  ;;  %v2356_v40 = vld [vmem:[%s2574_s22 + $0x189] sm:$0xff] }
 0x23b   : > { %v1842_v22 = vadd.f32 %v1764_v28, %v1648_v38  ;;  %1231 = vmatmul.f32.gmra.mxu1 %v2399_v29  ;;  %1426 = vmatmul.f32.gmra.mxu2 %v2305_v47 }
 0x23d   : > { %1874 = vst [vmem:[%s3405_s19 + $0x48] sm:$0xff] %v1842_v22  ;;  %v1905_v11 = vadd.f32 %v1904_v44, %v1842_v22  ;;  %v1943_v27 = vmul.f32 %v1842_v22, %v1842_v22  ;;  %1620 = vmatmul.f32.gmra.mxu3 %v3269_v61  ;;  %v2403_v44 = vld [vmem:[%s2574_s22 + $0x182] sm:$0xff] }
 0x23e   : > { %v1379_v34 = vpop.f32.mrf.mxu2  ;;  %v1767_v36 = vpop.f32.mrf.mxu0 }
 0x23f   : > { %v1974_v53 = vadd.f32 %v1973_v8, %v1943_v27  ;;  %v1455_v63 = vadd.f32 %v1379_v34, %v1260_v52  ;;  %v2308_v8 = vld [vmem:[%s2574_s22 + $0x188] sm:$0xff] }
 0x240   : > { %v1187_v5 = vpop.f32.mrf.mxu1  ;;  %v1573_v26 = vpop.f32.mrf.mxu3  ;;  %v2404_v52 = vld [vmem:[%s2574_s22 + $0x18a] sm:$0xff] }
 0x241   : > { %v1649_v19 = vadd.f32 %v1573_v26, %v1455_v63  ;;  %1814 = vmatmul.f32.gmra.mxu0 %v2401_v46  ;;  %v1261_v6 = vadd.f32 %v1187_v5, %v3265_v35  ;;  %v2357_v63 = vld [vmem:[%s2574_s22 + $0x199] sm:$0xff] }
 0x243   : > { %v1843_v18 = vadd.f32 %v1767_v36, %v1649_v19  ;;  %1234 = vmatmul.f32.gmra.mxu1 %v2400_v56  ;;  %1429 = vmatmul.f32.gmra.mxu2 %v2306_v31 }
 0x245   : > { %1875 = vst [vmem:[%s3405_s19 + $0x50] sm:$0xff] %v1843_v18  ;;  %v1906_v55 = vadd.f32 %v1905_v11, %v1843_v18  ;;  %v1944_v61 = vmul.f32 %v1843_v18, %v1843_v18  ;;  %1623 = vmatmul.f32.gmra.mxu3 %v3278_v50 }
 0x246   : > { %v1382_v1 = vpop.f32.mrf.mxu2  ;;  %v1770_v58 = vpop.f32.mrf.mxu0 }
 0x247   : > { %v1975_v32 = vadd.f32 %v1974_v53, %v1944_v61  ;;  %v1456_v29 = vadd.f32 %v1382_v1, %v1261_v6  ;;  %v2405_v6 = vld [vmem:[%s2574_s22 + $0x19a] sm:$0xff] }
 0x248   : > { %v1190_v43 = vpop.f32.mrf.mxu1  ;;  %v1576_v13 = vpop.f32.mrf.mxu3 }
 0x249   : > { %v1650_v10 = vadd.f32 %v1576_v13, %v1456_v29  ;;  %1817 = vmatmul.f32.gmra.mxu0 %v2402_v9  ;;  %v1262_v35 = vadd.f32 %v1190_v43, %v3274_v49  ;;  %v2358_v29 = vld [vmem:[%s2574_s22 + $0x1a1] sm:$0xff] }
 0x24b   : > { %v1844_v25 = vadd.f32 %v1770_v58, %v1650_v10  ;;  %1237 = vmatmul.f32.gmra.mxu1 %v2401_v46  ;;  %1432 = vmatmul.f32.gmra.mxu2 %v2307_v54  ;;  %v2309_v46 = vld [vmem:[%s2574_s22 + $0x198] sm:$0xff] }
 0x24d   : > { %1876 = vst [vmem:[%s3405_s19 + $0x58] sm:$0xff] %v1844_v25  ;;  %v1907_v50 = vadd.f32 %v1906_v55, %v1844_v25  ;;  %v1945_v16 = vmul.f32 %v1844_v25, %v1844_v25  ;;  %1626 = vmatmul.f32.gmra.mxu3 %v3287_v41 }
 0x24e   : > { %v1385_v45 = vpop.f32.mrf.mxu2  ;;  %v1773_v21 = vpop.f32.mrf.mxu0 }
 0x24f   : > { %v1976_v17 = vadd.f32 %v1975_v32, %v1945_v16  ;;  %v1457_v51 = vadd.f32 %v1385_v45, %v1262_v35  ;;  %v2406_v35 = vld [vmem:[%s2574_s22 + $0x1a2] sm:$0xff] }
 0x250   : > { %v1193_v28 = vpop.f32.mrf.mxu1  ;;  %v1579_v56 = vpop.f32.mrf.mxu3 }
 0x251   : > { %v1651_v59 = vadd.f32 %v1579_v56, %v1457_v51  ;;  %1820 = vmatmul.f32.gmra.mxu0 %v2403_v44  ;;  %v1263_v41 = vadd.f32 %v1193_v28, %v3283_v12 }
 0x253   : > { %v1845_v49 = vadd.f32 %v1773_v21, %v1651_v59  ;;  %1240 = vmatmul.f32.gmra.mxu1 %v2402_v9  ;;  %1435 = vmatmul.f32.gmra.mxu2 %v2308_v8  ;;  %v2310_v9 = vld [vmem:[%s2574_s22 + $0x1a0] sm:$0xff]  ;;  %s2102_s22 = sshll.u32 %s3526_s13, 3 }
 0x254   : > { %s181_s23 = scalar_lea.vmem %s3524_s3, %s2102_s22 }
 0x255   : > { %1877 = vst [vmem:[%s3405_s19 + $0x60] sm:$0xff] %v1845_v49  ;;  %v1908_v30 = vadd.f32 %v1907_v50, %v1845_v49  ;;  %v1946_v47 = vmul.f32 %v1845_v49, %v1845_v49  ;;  %1629 = vmatmul.f32.gmra.mxu3 %v2356_v40 }
 0x256   : > { %v1388_v38 = vpop.f32.mrf.mxu2  ;;  %v1776_v22 = vpop.f32.mrf.mxu0 }
 0x257   : > { %v1977_v11 = vadd.f32 %v1976_v17, %v1946_v47  ;;  %v1458_v27 = vadd.f32 %v1388_v38, %v1263_v41 }
 0x258   : > { %v1196_v34 = vpop.f32.mrf.mxu1  ;;  %v1582_v36 = vpop.f32.mrf.mxu3 }
 0x259   : > { %v1652_v53 = vadd.f32 %v1582_v36, %v1458_v27  ;;  %1823 = vmatmul.f32.gmra.mxu0 %v2404_v52  ;;  %v1264_v12 = vadd.f32 %v1196_v34, %v3292_v7 }
 0x25b   : > { %v1846_v5 = vadd.f32 %v1776_v22, %v1652_v53  ;;  %1243 = vmatmul.f32.gmra.mxu1 %v2403_v44  ;;  %1438 = vmatmul.f32.gmra.mxu2 %v2309_v46 }
 0x25d   : > { %1878 = vst [vmem:[%s3405_s19 + $0x68] sm:$0xff] %v1846_v5  ;;  %v1909_v26 = vadd.f32 %v1908_v30, %v1846_v5  ;;  %v1947_v31 = vmul.f32 %v1846_v5, %v1846_v5  ;;  %1632 = vmatmul.f32.gmra.mxu3 %v2357_v63 }
 0x25e   : > { %v1391_v19 = vpop.f32.mrf.mxu2  ;;  %v1779_v18 = vpop.f32.mrf.mxu0 }
 0x25f   : > { %v1978_v55 = vadd.f32 %v1977_v11, %v1947_v31  ;;  %v1459_v61 = vadd.f32 %v1391_v19, %v1264_v12 }
 0x260   : > { %v1199_v1 = vpop.f32.mrf.mxu1  ;;  %v1585_v58 = vpop.f32.mrf.mxu3 }
 0x261   : > { %v1653_v32 = vadd.f32 %v1585_v58, %v1459_v61  ;;  %1826 = vmatmul.f32.gmra.mxu0 %v2405_v6  ;;  %v1265_v7 = vadd.f32 %v1199_v1, %v3299_v4 }
 0x263   : > { %v1847_v43 = vadd.f32 %v1779_v18, %v1653_v32  ;;  %1246 = vmatmul.f32.gmra.mxu1 %v2404_v52  ;;  %1441 = vmatmul.f32.gmra.mxu2 %v2310_v9 }
 0x265   : > { %1879 = vst [vmem:[%s3405_s19 + $0x70] sm:$0xff] %v1847_v43  ;;  %v1910_v13 = vadd.f32 %v1909_v26, %v1847_v43  ;;  %v1948_v54 = vmul.f32 %v1847_v43, %v1847_v43  ;;  %1635 = vmatmul.f32.gmra.mxu3 %v2358_v29 }
 0x266   : > { %v1394_v10 = vpop.f32.mrf.mxu2  ;;  %v1782_v25 = vpop.f32.mrf.mxu0 }
 0x267   : > { %v1979_v50 = vadd.f32 %v1978_v55, %v1948_v54  ;;  %v1460_v16 = vadd.f32 %v1394_v10, %v1265_v7 }
 0x268   : > { %v1202_v45 = vpop.f32.mrf.mxu1  ;;  %v1588_v21 = vpop.f32.mrf.mxu3 }
 0x269   : > { %v1654_v44 = vadd.f32 %v1588_v21, %v1460_v16  ;;  %1829 = vmatmul.f32.gmra.mxu0 %v2406_v35  ;;  %v1266_v51 = vadd.f32 %v1202_v45, %v3306_v2 }
 0x26b   : > { %v1848_v17 = vadd.f32 %v1782_v25, %v1654_v44 }
 0x26d   : > { %1880 = vst [vmem:[%s3405_s19 + $0x78] sm:$0xff] %v1848_v17  ;;  %v1911_v4 = vadd.f32 %v1910_v13, %v1848_v17  ;;  %v1949_v28 = vmul.f32 %v1848_v17, %v1848_v17 }
 0x26e   : > { %v1397_v56 = vpop.f32.mrf.mxu2  ;;  %v1785_v8 = vpop.f32.mrf.mxu0 }
 0x26f   : > { %v1980_v59 = vadd.f32 %v1979_v50, %v1949_v28  ;;  %v1461_v40 = vadd.f32 %v1397_v56, %v1266_v51 }
 0x270   : > { %v1205_v49 = vpop.f32.mrf.mxu1  ;;  %v1591_v41 = vpop.f32.mrf.mxu3 }
 0x271   : > { %v1655_v30 = vadd.f32 %v1591_v41, %v1461_v40  ;;  %v1267_v38 = vadd.f32 %v1205_v49, %v3312_v14 }
 0x273   : > { %v1849_v47 = vadd.f32 %v1785_v8, %v1655_v30 }
 0x275   : > { %1881 = vst [vmem:[%s3405_s19 + $0x80] sm:$0xff] %v1849_v47  ;;  %v1912_v22 = vadd.f32 %v1911_v4, %v1849_v47  ;;  %v1950_v52 = vmul.f32 %v1849_v47, %v1849_v47 }
 0x276   : > { %v1400_v11 = vpop.f32.mrf.mxu2  ;;  %v1788_v27 = vpop.f32.mrf.mxu0 }
 0x277   : > { %v1981_v2 = vadd.f32 %v1980_v59, %v1950_v52  ;;  %v1462_v34 = vadd.f32 %v1400_v11, %v1267_v38 }
 0x278   : > { %v1208_v36 = vpop.f32.mrf.mxu1  ;;  %v1594_v46 = vpop.f32.mrf.mxu3 }
 0x279   : > { %v1656_v53 = vadd.f32 %v1594_v46, %v1462_v34  ;;  %v1268_v5 = vadd.f32 %v1208_v36, %v3318_v57 }
 0x27b   : > { %v1850_v63 = vadd.f32 %v1788_v27, %v1656_v53 }
 0x27d   : > { %1882 = vst [vmem:[%s3405_s19 + $0x88] sm:$0xff] %v1850_v63  ;;  %v1913_v12 = vadd.f32 %v1912_v22, %v1850_v63  ;;  %v1951_v26 = vmul.f32 %v1850_v63, %v1850_v63 }
 0x27e   : > { %v1403_v31 = vpop.f32.mrf.mxu2  ;;  %v1791_v19 = vpop.f32.mrf.mxu0 }
 0x27f   : > { %v1982_v14 = vadd.f32 %v1981_v2, %v1951_v26  ;;  %v1463_v18 = vadd.f32 %v1403_v31, %v1268_v5 }
 0x280   : > { %v1211_v6 = vpop.f32.mrf.mxu1  ;;  %v1597_v55 = vpop.f32.mrf.mxu3 }
 0x281   : > { %v1657_v61 = vadd.f32 %v1597_v55, %v1463_v18  ;;  %v1269_v58 = vadd.f32 %v1211_v6, %v3324_v0 }
 0x283   : > { %v1851_v1 = vadd.f32 %v1791_v19, %v1657_v61 }
 0x285   : > { %1883 = vst [vmem:[%s3405_s19 + $0x90] sm:$0xff] %v1851_v1  ;;  %v1914_v9 = vadd.f32 %v1913_v12, %v1851_v1  ;;  %v1952_v32 = vmul.f32 %v1851_v1, %v1851_v1 }
 0x286   : > { %v1406_v29 = vpop.f32.mrf.mxu2  ;;  %v1794_v43 = vpop.f32.mrf.mxu0 }
 0x287   : > { %v1983_v57 = vadd.f32 %v1982_v14, %v1952_v32  ;;  %v1464_v7 = vadd.f32 %v1406_v29, %v1269_v58 }
 0x288   : > { %v1214_v13 = vpop.f32.mrf.mxu1  ;;  %v1600_v54 = vpop.f32.mrf.mxu3 }
 0x289   : > { %v1658_v10 = vadd.f32 %v1600_v54, %v1464_v7  ;;  %v1270_v35 = vadd.f32 %v1214_v13, %v3330_v39 }
 0x28b   : > { %v1852_v25 = vadd.f32 %v1794_v43, %v1658_v10 }
 0x28d   : > { %1884 = vst [vmem:[%s3405_s19 + $0x98] sm:$0xff] %v1852_v25  ;;  %v1915_v50 = vadd.f32 %v1914_v9, %v1852_v25  ;;  %v1953_v16 = vmul.f32 %v1852_v25, %v1852_v25 }
 0x28e   : > { %v1409_v45 = vpop.f32.mrf.mxu2  ;;  %v1797_v21 = vpop.f32.mrf.mxu0 }
 0x28f   : > { %v1984_v0 = vadd.f32 %v1983_v57, %v1953_v16  ;;  %v1465_v44 = vadd.f32 %v1409_v45, %v1270_v35 }
 0x290   : > { %v1217_v17 = vpop.f32.mrf.mxu1  ;;  %v1603_v51 = vpop.f32.mrf.mxu3 }
 0x291   : > { %v1659_v4 = vadd.f32 %v1603_v51, %v1465_v44  ;;  %v1271_v56 = vadd.f32 %v1217_v17, %v3336_v62 }
 0x293   : > { %v1853_v28 = vadd.f32 %v1797_v21, %v1659_v4 }
 0x295   : > { %1885 = vst [vmem:[%s3405_s19 + $0xa0] sm:$0xff] %v1853_v28  ;;  %v1916_v8 = vadd.f32 %v1915_v50, %v1853_v28  ;;  %v1954_v59 = vmul.f32 %v1853_v28, %v1853_v28 }
 0x296   : > { %v1412_v40 = vpop.f32.mrf.mxu2  ;;  %v1800_v49 = vpop.f32.mrf.mxu0 }
 0x297   : > { %v1985_v39 = vadd.f32 %v1984_v0, %v1954_v59  ;;  %v1466_v41 = vadd.f32 %v1412_v40, %v1271_v56 }
 0x298   : > { %v1220_v30 = vpop.f32.mrf.mxu1  ;;  %v1606_v47 = vpop.f32.mrf.mxu3 }
 0x299   : > { %v1660_v38 = vadd.f32 %v1606_v47, %v1466_v41  ;;  %v1272_v52 = vadd.f32 %v1220_v30, %v3342_v37 }
 0x29b   : > { %v1854_v22 = vadd.f32 %v1800_v49, %v1660_v38 }
 0x29d   : > { %1886 = vst [vmem:[%s3405_s19 + $0xa8] sm:$0xff] %v1854_v22  ;;  %v1917_v11 = vadd.f32 %v1916_v8, %v1854_v22  ;;  %v1955_v27 = vmul.f32 %v1854_v22, %v1854_v22 }
 0x29e   : > { %v1415_v2 = vpop.f32.mrf.mxu2  ;;  %v1803_v34 = vpop.f32.mrf.mxu0 }
 0x29f   : > { %v1986_v62 = vadd.f32 %v1985_v39, %v1955_v27  ;;  %v1467_v36 = vadd.f32 %v1415_v2, %v1272_v52 }
 0x2a0   : > { %v1223_v46 = vpop.f32.mrf.mxu1  ;;  %v1609_v53 = vpop.f32.mrf.mxu3 }
 0x2a1   : > { %v1661_v63 = vadd.f32 %v1609_v53, %v1467_v36  ;;  %v1273_v12 = vadd.f32 %v1223_v46, %v3348_v23 }
 0x2a3   : > { %v1855_v5 = vadd.f32 %v1803_v34, %v1661_v63 }
 0x2a5   : > { %1887 = vst [vmem:[%s3405_s19 + $0xb0] sm:$0xff] %v1855_v5  ;;  %v1918_v26 = vadd.f32 %v1917_v11, %v1855_v5  ;;  %v1956_v31 = vmul.f32 %v1855_v5, %v1855_v5 }
 0x2a6   : > { %v1418_v19 = vpop.f32.mrf.mxu2  ;;  %v1806_v14 = vpop.f32.mrf.mxu0 }
 0x2a7   : > { %v1987_v37 = vadd.f32 %v1986_v62, %v1956_v31  ;;  %v1468_v18 = vadd.f32 %v1418_v19, %v1273_v12 }
 0x2a8   : > { %v1226_v6 = vpop.f32.mrf.mxu1  ;;  %v1612_v55 = vpop.f32.mrf.mxu3 }
 0x2a9   : > { %v1662_v61 = vadd.f32 %v1612_v55, %v1468_v18  ;;  %v1274_v58 = vadd.f32 %v1226_v6, %v3354_v15 }
 0x2ab   : > { %v1856_v1 = vadd.f32 %v1806_v14, %v1662_v61 }
 0x2ad   : > { %1888 = vst [vmem:[%s3405_s19 + $0xb8] sm:$0xff] %v1856_v1  ;;  %v1919_v9 = vadd.f32 %v1918_v26, %v1856_v1  ;;  %v1957_v32 = vmul.f32 %v1856_v1, %v1856_v1 }
 0x2ae   : > { %v1421_v29 = vpop.f32.mrf.mxu2  ;;  %v1809_v43 = vpop.f32.mrf.mxu0 }
 0x2af   : > { %v1988_v23 = vadd.f32 %v1987_v37, %v1957_v32  ;;  %v1469_v57 = vadd.f32 %v1421_v29, %v1274_v58 }
 0x2b0   : > { %v1229_v7 = vpop.f32.mrf.mxu1  ;;  %v1615_v13 = vpop.f32.mrf.mxu3 }
 0x2b1   : > { %v1663_v54 = vadd.f32 %v1615_v13, %v1469_v57  ;;  %v1275_v25 = vadd.f32 %v1229_v7, %v3360_v33 }
 0x2b3   : > { %v1857_v10 = vadd.f32 %v1809_v43, %v1663_v54 }
 0x2b5   : > { %1889 = vst [vmem:[%s3405_s19 + $0xc0] sm:$0xff] %v1857_v10  ;;  %v1920_v35 = vadd.f32 %v1919_v9, %v1857_v10  ;;  %v1958_v50 = vmul.f32 %v1857_v10, %v1857_v10 }
 0x2b6   : > { %v1424_v16 = vpop.f32.mrf.mxu2  ;;  %v1812_v45 = vpop.f32.mrf.mxu0 }
 0x2b7   : > { %v1989_v15 = vadd.f32 %v1988_v23, %v1958_v50  ;;  %v1470_v21 = vadd.f32 %v1424_v16, %v1275_v25 }
 0x2b8   : > { %v1232_v0 = vpop.f32.mrf.mxu1  ;;  %v1618_v44 = vpop.f32.mrf.mxu3 }
 0x2b9   : > { %v1664_v17 = vadd.f32 %v1618_v44, %v1470_v21  ;;  %v1276_v4 = vadd.f32 %v1232_v0, %v3366_v20 }
 0x2bb   : > { %v1858_v51 = vadd.f32 %v1812_v45, %v1664_v17 }
 0x2bd   : > { %1890 = vst [vmem:[%s3405_s19 + $0xc8] sm:$0xff] %v1858_v51  ;;  %v1921_v28 = vadd.f32 %v1920_v35, %v1858_v51  ;;  %v1959_v56 = vmul.f32 %v1858_v51, %v1858_v51 }
 0x2be   : > { %v1427_v8 = vpop.f32.mrf.mxu2  ;;  %v1815_v59 = vpop.f32.mrf.mxu0 }
 0x2bf   : > { %v1990_v33 = vadd.f32 %v1989_v15, %v1959_v56  ;;  %v1471_v40 = vadd.f32 %v1427_v8, %v1276_v4 }
 0x2c0   : > { %v1235_v49 = vpop.f32.mrf.mxu1  ;;  %v1621_v39 = vpop.f32.mrf.mxu3 }
 0x2c1   : > { %v1665_v41 = vadd.f32 %v1621_v39, %v1471_v40  ;;  %v1277_v47 = vadd.f32 %v1235_v49, %v3372_v24 }
 0x2c3   : > { %v1859_v30 = vadd.f32 %v1815_v59, %v1665_v41 }
 0x2c5   : > { %1891 = vst [vmem:[%s3405_s19 + $0xd0] sm:$0xff] %v1859_v30  ;;  %v1922_v38 = vadd.f32 %v1921_v28, %v1859_v30  ;;  %v1960_v22 = vmul.f32 %v1859_v30, %v1859_v30 }
 0x2c6   : > { %v1430_v52 = vpop.f32.mrf.mxu2  ;;  %v1818_v11 = vpop.f32.mrf.mxu0 }
 0x2c7   : > { %v1991_v20 = vadd.f32 %v1990_v33, %v1960_v22  ;;  %v1472_v27 = vadd.f32 %v1430_v52, %v1277_v47 }
 0x2c8   : > { %v1238_v2 = vpop.f32.mrf.mxu1  ;;  %v1624_v34 = vpop.f32.mrf.mxu3 }
 0x2c9   : > { %v1666_v62 = vadd.f32 %v1624_v34, %v1472_v27  ;;  %v1278_v46 = vadd.f32 %v1238_v2, %v3378_v3 }
 0x2cb   : > { %v1860_v36 = vadd.f32 %v1818_v11, %v1666_v62 }
 0x2cd   : > { %1892 = vst [vmem:[%s3405_s19 + $0xd8] sm:$0xff] %v1860_v36  ;;  %v1923_v53 = vadd.f32 %v1922_v38, %v1860_v36  ;;  %v1961_v63 = vmul.f32 %v1860_v36, %v1860_v36 }
 0x2ce   : > { %v1433_v5 = vpop.f32.mrf.mxu2  ;;  %v1821_v12 = vpop.f32.mrf.mxu0 }
 0x2cf   : > { %v1992_v24 = vadd.f32 %v1991_v20, %v1961_v63  ;;  %v1473_v26 = vadd.f32 %v1433_v5, %v1278_v46 }
 0x2d0   : > { %v1241_v31 = vpop.f32.mrf.mxu1  ;;  %v1627_v19 = vpop.f32.mrf.mxu3 }
 0x2d1   : > { %v1667_v14 = vadd.f32 %v1627_v19, %v1473_v26  ;;  %v1279_v18 = vadd.f32 %v1241_v31, %v3384_v42 }
 0x2d3   : > { %v1861_v37 = vadd.f32 %v1821_v12, %v1667_v14 }
 0x2d5   : > { %1893 = vst [vmem:[%s3405_s19 + $0xe0] sm:$0xff] %v1861_v37  ;;  %v1924_v6 = vadd.f32 %v1923_v53, %v1861_v37  ;;  %v1962_v55 = vmul.f32 %v1861_v37, %v1861_v37 }
 0x2d6   : > { %v1436_v61 = vpop.f32.mrf.mxu2  ;;  %v1824_v1 = vpop.f32.mrf.mxu0 }
 0x2d7   : > { %v1993_v3 = vadd.f32 %v1992_v24, %v1962_v55  ;;  %v1474_v58 = vadd.f32 %v1436_v61, %v1279_v18 }
 0x2d8   : > { %v1244_v9 = vpop.f32.mrf.mxu1  ;;  %v1630_v32 = vpop.f32.mrf.mxu3 }
 0x2d9   : > { %v1668_v29 = vadd.f32 %v1630_v32, %v1474_v58  ;;  %v1280_v23 = vadd.f32 %v1244_v9, %v3390_v48 }
 0x2db   : > { %v1862_v43 = vadd.f32 %v1824_v1, %v1668_v29 }
 0x2dd   : > { %1894 = vst [vmem:[%s3405_s19 + $0xe8] sm:$0xff] %v1862_v43  ;;  %v1925_v57 = vadd.f32 %v1924_v6, %v1862_v43  ;;  %v1963_v7 = vmul.f32 %v1862_v43, %v1862_v43 }
 0x2de   : > { %v1439_v13 = vpop.f32.mrf.mxu2  ;;  %v1827_v54 = vpop.f32.mrf.mxu0 }
 0x2df   : > { %v1994_v42 = vadd.f32 %v1993_v3, %v1963_v7  ;;  %v1475_v10 = vadd.f32 %v1439_v13, %v1280_v23 }
 0x2e0   : > { %v1633_v25 = vpop.f32.mrf.mxu3  ;;  %v1247_v50 = vpop.f32.mrf.mxu1 }
 0x2e1   : > { %v1669_v35 = vadd.f32 %v1633_v25, %v1475_v10  ;;  %v1281_v45 = vadd.f32 %v1247_v50, %v3396_v60 }
 0x2e3   : > { %v1863_v16 = vadd.f32 %v1827_v54, %v1669_v35 }
 0x2e5   : > { %1895 = vst [vmem:[%s3405_s19 + $0xf0] sm:$0xff] %v1863_v16  ;;  %v1926_v15 = vadd.f32 %v1925_v57, %v1863_v16  ;;  %v1964_v21 = vmul.f32 %v1863_v16, %v1863_v16 }
 0x2e6   : > { %v1442_v0 = vpop.f32.mrf.mxu2  ;;  %v1830_v51 = vpop.f32.mrf.mxu0 }
 0x2e7   : > { %v1995_v44 = vadd.f32 %v1994_v42, %v1964_v21  ;;  %v1476_v48 = vadd.f32 %v1442_v0, %v1281_v45 }
 0x2e8   : > { %v1636_v17 = vpop.f32.mrf.mxu3 }
 0x2e9   : > { %v1670_v4 = vadd.f32 %v1636_v17, %v1476_v48 }
 0x2eb   : > { %v1864_v28 = vadd.f32 %v1830_v51, %v1670_v4 }
 0x2ed   : > { %1896 = vst [vmem:[%s3405_s19 + $0xf8] sm:$0xff] %v1864_v28  ;;  %v1927_v56 = vadd.f32 %v1926_v15, %v1864_v28  ;;  %v1965_v8 = vmul.f32 %v1864_v28, %v1864_v28 }
 0x2ef   : > { %v1928_v59 = vrot.slane %v1927_v56, 4  ;;  %v1996_v33 = vadd.f32 %v1995_v44, %v1965_v8 }
 0x2f1   : > { %v1929_v40 = vadd.f32 %v1928_v59, %v1927_v56  ;;  %v1997_v49 = vrot.slane %v1996_v33, 4 }
 0x2f3   : > { %v1930_v39 = vrot.slane %v1929_v40, 2  ;;  %v1998_v60 = vadd.f32 %v1997_v49, %v1996_v33 }
 0x2f5   : > { %v1931_v41 = vadd.f32 %v1930_v39, %v1929_v40  ;;  %v1999_v30 = vrot.slane %v1998_v60, 2 }
 0x2f7   : > { %v1932_v47 = vrot.slane %v1931_v41, 1  ;;  %v2000_v38 = vadd.f32 %v1999_v30, %v1998_v60 }
 0x2f9   : > { %v2001_v22 = vrot.slane %v2000_v38, 1  ;;  %v1933_v52 = vadd.f32 %v1932_v47, %v1931_v41 }
 0x2fb   : > { %v2002_v11 = vadd.f32 %v2001_v22, %v2000_v38 }
 0x2fd   : > { %v2004_v20 = vsel %vm2003_vm0, %v1933_v52, %v2002_v11 }
 0x2fe   : > { %v2006_v27 = vsel %vm2005_vm1, %v2004_v20, 0.0 }
 0x2ff   : > { %2007 = vst [vmem:[%s181_s23] sm:$0xff] %v2006_v27 }
 0x300 PF: > { %s14_s12 = sadd.s32 1, %s2489_s12  }
 0x301   : > { %p11_p4 = scmp.ge.s32.totalorder %s14_s12, 4  }
 0x303   :  { %13 = sbr.rel (!%p11_p4) target bundleno = 1 (0x1), region = 80 }

</bundles_post_ra>
